<compile_context>
chip_gen: v5e
topology: v5e:2x2
jax: 0.10.0
libtpu: 0.0.40
codegen_flags: <defaults>
</compile_context>

<pallas_src>
import math
from functools import partial

import jax
import jax.numpy as jnp
from jax.experimental import pallas as pl
from jax.experimental.pallas import tpu as pltpu


def _rup(x, m):
    return ((x + m - 1) // m) * m


# ----------------------------------------------------------------------------
# Pallas tiled matmul: bf16 operands, f32 accumulation directly in the output.
# ----------------------------------------------------------------------------
def _matmul_kernel(a_ref, b_ref, o_ref):
    @pl.when(pl.program_id(2) == 0)
    def _():
        o_ref[...] = jnp.zeros_like(o_ref)

    o_ref[...] += jnp.dot(a_ref[...], b_ref[...],
                          preferred_element_type=jnp.float32)


def _pick_tk(K):
    if K <= 2048:
        return K                      # single K block -> no accumulator revisit
    for cand in (2048, 1024, 512, 256, 128):
        if K % cand == 0:
            return cand
    return K


def pallas_matmul(a, b):
    """a: (M, K), b: (K, N)  ->  (M, N) float32.  No padding copies: pl.cdiv
    grid, Pallas clips edge-block writes (garbage edge rows are dropped)."""
    M, K = a.shape
    K2, N = b.shape
    assert K == K2
    tm = min(512, _rup(M, 8))
    tn = N if N <= 256 else 256
    tk = _pick_tk(K)
    grid = (pl.cdiv(M, tm), pl.cdiv(N, tn), pl.cdiv(K, tk))
    return pl.pallas_call(
        _matmul_kernel,
        out_shape=jax.ShapeDtypeStruct((M, N), jnp.float32),
        grid=grid,
        in_specs=[pl.BlockSpec((tm, tk), lambda i, j, k: (i, k)),
                  pl.BlockSpec((tk, tn), lambda i, j, k: (k, j))],
        out_specs=pl.BlockSpec((tm, tn), lambda i, j, k: (i, j)),
        compiler_params=pltpu.CompilerParams(
            dimension_semantics=("parallel", "parallel", "arbitrary"),
            vmem_limit_bytes=32 * 1024 * 1024),
    )(a, b)


# ----------------------------------------------------------------------------
# Pallas fused BatchNorm: one stats pass (sum / sumsq) + one affine(+res)(+ReLU)
# ----------------------------------------------------------------------------
def _row_tile(M, C, target_bytes=1 << 20):
    lane_c = max(C, 128)              # minor dim pads to 128 lanes in VMEM
    rows = target_bytes // (lane_c * 4)
    rows = max(256, min(rows, 4096))
    rows = _rup(rows, 8)
    return min(rows, _rup(M, 8))


def _bn_stats_kernel(x_ref, sum_ref, sq_ref, *, rows, block_rows):
    @pl.when(pl.program_id(0) == 0)
    def _():
        sum_ref[...] = jnp.zeros_like(sum_ref)
        sq_ref[...] = jnp.zeros_like(sq_ref)

    xb = x_ref[...]
    rid = (pl.program_id(0) * block_rows
           + jax.lax.broadcasted_iota(jnp.int32, (block_rows, 1), 0))
    xb = jnp.where(rid < rows, xb, 0.0)     # mask edge-block garbage rows
    sum_ref[...] += jnp.sum(xb, axis=0, keepdims=True)
    sq_ref[...] += jnp.sum(xb * xb, axis=0, keepdims=True)


def bn_stats(x2):
    M, C = x2.shape
    tr = _row_tile(M, C)
    s1, s2 = pl.pallas_call(
        partial(_bn_stats_kernel, rows=M, block_rows=tr),
        out_shape=(jax.ShapeDtypeStruct((1, C), jnp.float32),
                   jax.ShapeDtypeStruct((1, C), jnp.float32)),
        grid=(pl.cdiv(M, tr),),
        in_specs=[pl.BlockSpec((tr, C), lambda i: (i, 0))],
        out_specs=(pl.BlockSpec((1, C), lambda i: (0, 0)),
                   pl.BlockSpec((1, C), lambda i: (0, 0))),
        compiler_params=pltpu.CompilerParams(
            dimension_semantics=("arbitrary",)),
    )(x2)
    return s1[0], s2[0]


def _make_affine_kernel(relu, has_res):
    if has_res:
        def kernel(x_ref, r_ref, sc_ref, sh_ref, o_ref):
            y = x_ref[...] * sc_ref[...] + sh_ref[...] + r_ref[...]
            if relu:
                y = jnp.maximum(y, 0.0)
            o_ref[...] = y
    else:
        def kernel(x_ref, sc_ref, sh_ref, o_ref):
            y = x_ref[...] * sc_ref[...] + sh_ref[...]
            if relu:
                y = jnp.maximum(y, 0.0)
            o_ref[...] = y
    return kernel


def affine_act(x2, scale, shift, residual=None, relu=True):
    M, C = x2.shape
    tr = _row_tile(M, C)
    args = [x2]
    in_specs = [pl.BlockSpec((tr, C), lambda i: (i, 0))]
    if residual is not None:
        args.append(residual)
        in_specs.append(pl.BlockSpec((tr, C), lambda i: (i, 0)))
    args += [scale.reshape(1, C), shift.reshape(1, C)]
    in_specs += [pl.BlockSpec((1, C), lambda i: (0, 0)),
                 pl.BlockSpec((1, C), lambda i: (0, 0))]
    return pl.pallas_call(
        _make_affine_kernel(relu, residual is not None),
        out_shape=jax.ShapeDtypeStruct((M, C), jnp.float32),
        grid=(pl.cdiv(M, tr),),
        in_specs=in_specs,
        out_specs=pl.BlockSpec((tr, C), lambda i: (i, 0)),
        compiler_params=pltpu.CompilerParams(
            dimension_semantics=("parallel",)),
    )(*args)


@partial(jax.jit, static_argnames=("relu",))
def batchnorm_relu(x, residual=None, relu=True, eps=1e-5):
    """Training-mode BatchNorm3d (weight=1, bias=0) + optional residual + ReLU."""
    N, D, H, W, C = x.shape
    x2 = x.reshape(-1, C)
    M = x2.shape[0]
    s1, s2 = bn_stats(x2)
    mean = s1 / M
    var = jnp.maximum(s2 / M - mean * mean, 0.0)
    scale = 1.0 / jnp.sqrt(var + eps)
    shift = -mean * scale
    r2 = None if residual is None else residual.reshape(-1, C)
    y = affine_act(x2, scale, shift, residual=r2, relu=relu)
    return y.reshape(N, D, H, W, C)


# ----------------------------------------------------------------------------
# 3D convolution (channels-last) -> Pallas GEMM with bf16 operands
# ----------------------------------------------------------------------------
@partial(jax.jit, static_argnames=("stride", "pad"))
def conv3d(x, w, stride=(1, 1, 1), pad=(0, 0, 0)):
    """x: (N,D,H,W,Cin) f32, w: (kd,kh,kw,Cin,Cout) -> (N,Do,Ho,Wo,Cout) f32."""
    N, D, H, W, Cin = x.shape
    kd, kh, kw, _, Cout = w.shape
    sd, sh, sw = stride
    pd, ph, pw = pad
    Do = (D + 2 * pd - kd) // sd + 1
    Ho = (H + 2 * ph - kh) // sh + 1
    Wo = (W + 2 * pw - kw) // sw + 1
    w2 = w.reshape(kd * kh * kw * Cin, Cout).astype(jnp.bfloat16)

    if (kd, kh, kw) == (1, 1, 1) and (pd, ph, pw) == (0, 0, 0):
        # 1x1x1 conv: no patch materialization at all.
        xs = x if (sd, sh, sw) == (1, 1, 1) else x[:, ::sd, ::sh, ::sw, :]
        a2 = xs.reshape(N * Do * Ho * Wo, Cin).astype(jnp.bfloat16)
    else:
        # Multi-tap conv: build the tap matrix once, directly in bf16.
        xp = jnp.pad(x, ((0, 0), (pd, pd), (ph, ph), (pw, pw), (0, 0)))
        taps = []
        for a in range(kd):
            for b in range(kh):
                for c in range(kw):
                    taps.append(
                        xp[:, a:a + (Do - 1) * sd + 1:sd,
                              b:b + (Ho - 1) * sh + 1:sh,
                              c:c + (Wo - 1) * sw + 1:sw, :].astype(jnp.bfloat16))
        a2 = jnp.concatenate(taps, axis=-1).reshape(
            N * Do * Ho * Wo, kd * kh * kw * Cin)

    out = pallas_matmul(a2, w2)
    return out.reshape(N, Do, Ho, Wo, Cout)


@jax.jit
def maxpool3d(x):
    """MaxPool3d(kernel_size=3, stride=2, padding=1) on NDHWC.
    TODO(synk): not exercised by the reduced (no_max_pool=True) self-test;
    a single-pass Pallas version is future work."""
    N, D, H, W, C = x.shape
    k, s, p = 3, 2, 1
    xp = jnp.pad(x, ((0, 0), (p, p), (p, p), (p, p), (0, 0)),
                 constant_values=-jnp.inf)
    Do = (D + 2 * p - k) // s + 1
    Ho = (H + 2 * p - k) // s + 1
    Wo = (W + 2 * p - k) // s + 1
    out = None
    for a in range(k):
        for b in range(k):
            for c in range(k):
                sl = xp[:, a:a + (Do - 1) * s + 1:s,
                           b:b + (Ho - 1) * s + 1:s,
                           c:c + (Wo - 1) * s + 1:s, :]
                out = sl if out is None else jnp.maximum(out, sl)
    return out


def bottleneck(x, blk):
    st = blk['stride']
    out = conv3d(x, blk['w1'])
    out = batchnorm_relu(out, relu=True)
    out = conv3d(out, blk['w2'], stride=(st, st, st), pad=(1, 1, 1))
    out = batchnorm_relu(out, relu=True)
    out = conv3d(out, blk['w3'])
    if 'wds' in blk:
        res = conv3d(x, blk['wds'], stride=(st, st, st))
        res = batchnorm_relu(res, relu=False)
    else:
        res = x
    return batchnorm_relu(out, residual=res, relu=True)   # relu(bn(conv)+res)


# ----------------------------------------------------------------------------
# Parameter init (deterministic, matching the PyTorch module's shapes)
# ----------------------------------------------------------------------------
def kaiming_conv(key, kd, kh, kw, cin, cout):
    std = math.sqrt(2.0 / (cout * kd * kh * kw))  # kaiming_normal_, fan_out, relu
    return jax.random.normal(key, (kd, kh, kw, cin, cout), jnp.float32) * std


def init_params(key, batch_size=2, num_metadata=3,
                layers=(1, 1, 1, 1), block_inplanes=(8, 16, 32, 64)):
    keys = iter(jax.random.split(key, 128))
    P = {}
    P['conv1'] = kaiming_conv(next(keys), 7, 7, 7, 1, block_inplanes[0])
    in_planes = block_inplanes[0]
    P['layers'] = []
    strides = (1, 2, 2, 2)
    for planes, nblocks, stride in zip(block_inplanes, layers, strides):
        blocks = []
        for bi in range(nblocks):
            st = stride if bi == 0 else 1
            blk = {
                'w1': kaiming_conv(next(keys), 1, 1, 1, in_planes, planes),
                'w2': kaiming_conv(next(keys), 3, 3, 3, planes, planes),
                'w3': kaiming_conv(next(keys), 1, 1, 1, planes, planes * 4),
                'stride': st,
            }
            if st != 1 or in_planes != planes * 4:
                blk['wds'] = kaiming_conv(next(keys), 1, 1, 1, in_planes, planes * 4)
            in_planes = planes * 4
            blocks.append(blk)
        P['layers'].append(blocks)
    # LayerNorm([6, 4, 3]) affine params (init: weight=1, bias=0)
    P['ln_w'] = jnp.ones((6, 4, 3), jnp.float32)
    P['ln_b'] = jnp.zeros((6, 4, 3), jnp.float32)
    # PMDN layer: cfs (non-trainable metadata) + beta over [intercept, metadata]
    feat = 6 * 4 * 3 * in_planes
    P['cfs'] = jax.random.normal(next(keys), (batch_size, num_metadata), jnp.float32)
    P['pmdn_beta'] = jax.random.normal(next(keys), (num_metadata + 1, feat),
                                       jnp.float32)
    P['final_c'] = in_planes
    return P


# ----------------------------------------------------------------------------
# Full forward pass (matches PMDNResNet.forward: returns (pooled feats, loss))
# ----------------------------------------------------------------------------
def pmdn_resnet_forward(x_ncdhw, P, no_max_pool=True):
    # layout: PyTorch NCDHW -> NDHWC so channels ride the 128-lane axis.
    x = jnp.transpose(x_ncdhw, (0, 2, 3, 4, 1)).astype(jnp.float32)

    # stem
    x = conv3d(x, P['conv1'], stride=(1, 2, 2), pad=(3, 3, 3))
    x = batchnorm_relu(x, relu=True)
    if not no_max_pool:
        x = maxpool3d(x)

    # layer1..layer4 (Bottleneck blocks)
    for blocks in P['layers']:
        for blk in blocks:
            x = bottleneck(x, blk)
    # x: (N, 6, 4, 3, Cf)
    Nb, Dd, Hh, Ww, Cf = x.shape

    # ln1 = LayerNorm([6,4,3]): normalize each (6,4,3) slab per (n, c)
    mu = jnp.mean(x, axis=(1, 2, 3), keepdims=True)
    var = jnp.mean(jnp.square(x - mu), axis=(1, 2, 3), keepdims=True)
    x = (x - mu) / jnp.sqrt(var + 1e-5)
    x = x * P['ln_w'][None, :, :, :, None] + P['ln_b'][None, :, :, :, None]

    # PMDN layer (reconstruction; see TODO at top).  Tiny-K matmul in plain jnp.
    f = jnp.transpose(x, (0, 4, 1, 2, 3)).reshape(Nb, -1)   # (C,D,H,W) flatten order
    X = jnp.concatenate([jnp.ones((Nb, 1), jnp.float32), P['cfs']], axis=1)
    pred = X @ P['pmdn_beta']                                # (N, 72*Cf)
    loss_term = jnp.mean(jnp.square(f - pred))
    f = f - pred + P['pmdn_beta'][0][None, :]                # remove metadata effect

    # AdaptiveAvgPool3d((1,1,1)) + flatten
    h = jnp.mean(f.reshape(Nb, Cf, Dd * Hh * Ww), axis=-1)   # (N, Cf)
    return h, loss_term


if __name__ == "__main__":
    key = jax.random.PRNGKey(0)
    k_param, k_input = jax.random.split(key)

    BATCH = 2
    # Smallest input consistent with the module's hard-coded LayerNorm([6,4,3])
    # when no_max_pool=True: (41, 49, 33) -> (6, 4, 3) after layer4.
    IN_SHAPE = (41, 49, 33)

    params = init_params(k_param, batch_size=BATCH, num_metadata=3,
                         layers=(1, 1, 1, 1), block_inplanes=(8, 16, 32, 64))
    x = jax.random.normal(k_input, (BATCH, 1) + IN_SHAPE, jnp.float32)  # NCDHW

    out, loss = pmdn_resnet_forward(x, params, no_max_pool=True)
    jax.block_until_ready(out)
    jax.block_until_ready(loss)
    assert out.shape == (BATCH, params['final_c'])
    assert bool(jnp.isfinite(loss)) and bool(jnp.all(jnp.isfinite(out)))
    print("KERNEL_OK")
</pallas_src>

<mosaic_0001>
module attributes {stable_mosaic.version = 11 : i64} {
  func.func @_matmul_kernel(%arg0: i32, %arg1: i32, %arg2: i32, %arg3: memref<512x343xbf16, #tpu.memory_space<vmem>>, %arg4: memref<343x8xbf16, #tpu.memory_space<vmem>>, %arg5: memref<512x8xf32, #tpu.memory_space<vmem>>) attributes {dimension_semantics = [#tpu.dimension_semantics<parallel>, #tpu.dimension_semantics<parallel>, #tpu.dimension_semantics<arbitrary>], iteration_bounds = array<i64: 69, 1, 1>, scalar_prefetch = 0 : i64, scratch_operands = 0 : i64, tpu.core_type = #tpu.core_type<tc>, window_params = [{transform_indices = @transform_0, window_bounds = array<i64: 512, 343>}, {transform_indices = @transform_1, window_bounds = array<i64: 343, 8>}, {transform_indices = @transform_2, window_bounds = array<i64: 512, 8>}]} {
    %c0_i32 = arith.constant 0 : i32
    %0 = arith.cmpi eq, %arg2, %c0_i32 : i32
    %1 = arith.extui %0 : i1 to i32
    %c0_i32_0 = arith.constant 0 : i32
    %2 = arith.cmpi ne, %1, %c0_i32_0 : i32
    scf.if %2 {
      %cst_8 = arith.constant 0.000000e+00 : f32
      %9 = vector.broadcast %cst_8 : f32 to vector<512x8xf32>
      %c0_9 = arith.constant 0 : index
      %c0_10 = arith.constant 0 : index
      %10 = vector.load %arg5[%c0_9, %c0_10] : memref<512x8xf32, #tpu.memory_space<vmem>>, vector<512x8xf32>
      tpu.vector_store %arg5[%c0_9, %c0_10], %9 {strides = array<i32>} : memref<512x8xf32, #tpu.memory_space<vmem>>, vector<512x8xf32>,
    } else {
    }
    %c0 = arith.constant 0 : index
    %c0_1 = arith.constant 0 : index
    %3 = vector.load %arg5[%c0, %c0_1] : memref<512x8xf32, #tpu.memory_space<vmem>>, vector<512x8xf32>
    %c0_2 = arith.constant 0 : index
    %c0_3 = arith.constant 0 : index
    %4 = vector.load %arg3[%c0_2, %c0_3] : memref<512x343xbf16, #tpu.memory_space<vmem>>, vector<512x343xbf16>
    %c0_4 = arith.constant 0 : index
    %c0_5 = arith.constant 0 : index
    %5 = vector.load %arg4[%c0_4, %c0_5] : memref<343x8xbf16, #tpu.memory_space<vmem>>, vector<343x8xbf16>
    %cst = arith.constant dense<0.000000e+00> : vector<512x8xf32>
    %6 = tpu.matmul %4, %5, %cst {dimension_numbers = #tpu.dot_dimension_numbers<[1], [0], [0], [1], [0, 0, 1, 1], [], []>} : vector<512x343xbf16>, vector<343x8xbf16>, vector<512x8xf32> -> vector<512x8xf32>
    %7 = arith.addf %3, %6 : vector<512x8xf32>
    %c0_6 = arith.constant 0 : index
    %c0_7 = arith.constant 0 : index
    %8 = vector.load %arg5[%c0_6, %c0_7] : memref<512x8xf32, #tpu.memory_space<vmem>>, vector<512x8xf32>
    tpu.vector_store %arg5[%c0_6, %c0_7], %7 {strides = array<i32>} : memref<512x8xf32, #tpu.memory_space<vmem>>, vector<512x8xf32>,
    return
  }
  func.func @transform_0(%arg0: i32, %arg1: i32, %arg2: i32) -> (i32, i32) {
    %c0_i32 = arith.constant 0 : i32
    return %arg0, %arg2 : i32, i32
  }
  func.func @transform_1(%arg0: i32, %arg1: i32, %arg2: i32) -> (i32, i32) {
    %c0_i32 = arith.constant 0 : i32
    return %arg2, %arg1 : i32, i32
  }
  func.func @transform_2(%arg0: i32, %arg1: i32, %arg2: i32) -> (i32, i32) {
    %c0_i32 = arith.constant 0 : i32
    return %arg0, %arg1 : i32, i32
  }
}

</mosaic_0001>

<bundles_post_ra>
// kernel: conv3d.1
= control target key start
LH: loop header
LB: loop body
LE: loop exit
PB: predicated region body
PF: predicated region fallthrough
CT: control target
= control target key end

     0   :  { %s3171_s9 = smov 0   ;;  %s3173_s10 = smov 0   ;;  %s4184_s0 = inlined_call_operand.vmem [shape: bf16[34850,343], index: 0, kind: input, shape index: {}]   ;;  %s4185_s1 = inlined_call_operand.vmem [shape: bf16[343,8], index: 1, kind: input, shape index: {}]   ;;  %s4186_s2 = inlined_call_operand.vmem [shape: f32[34850,8], index: 2, kind: output, shape index: {}]  }
   0x1   :  { %s3175_s11 = smov 0   ;;  %s3177_s12 = smov 0  }
   0x2   :  { %s3179_s13 = smov 0  }
   0x3 LB: > { %s2275_s14 = sadd.s32 4294967295, %s3120_s13   ;;  %s31_s15 = sadd.s32 1, %s3116_s12  ;;  %s3120_s13 = sphi %s3179_s13, %s12_s13   ;;  %s3116_s12 = sphi %s3177_s12, %s4196_s12   ;;  %s3112_s11 = sphi %s3175_s11, %s4195_s11   ;;  %s3108_s10 = sphi %s3173_s10, %s4194_s10   ;;  %s3104_s9 = sphi %s3171_s9, %s4193_s9  }
   0x4   : > { %p33_p0 = scmp.ge.s32.totalorder %s31_s15, 69  ;;  %s96_s16 = sadd.s32 1, %s3108_s10 }
   0x5   : > { %p106_p1 = scmp.ne.s32.totalorder %s3108_s10, %s3104_s9  ;;  %p107_p2 = scmp.eq.s32.totalorder %s2275_s14, 68 }
   0x6   : > { %s4198_s15 = smov (%p33_p0, %s31_s15), 0  ;;  %p2280_p4 = scmp.ge.s32.totalorder %s3120_s13, 1 }
   0x7   : > { %p3203_p3 = por %p107_p2, %p106_p1  ;;  %s91_s18 = ssub.s32 %s3116_s12, %s4198_s15 }
   0x8   : > { %p168_p5 = scmp.lt.s32.totalorder %s3120_s13, 70  ;;  %p94_p6 = scmp.eq.s32.totalorder %s91_s18, 0 }
   0xa   : > { %p169_p7 = pnand %p2280_p4, %p168_p5 }
   0xb   : > { %s3212_s19 = scalar_select %p94_p6, %s3108_s10, %s96_s16  }
   0xc   : > { %172 = sbr.rel (%p169_p7) target bundleno = 640 (0x280), region = 28  ;;  %s3240_s4 = sshll.u32 (!%p169_p7), %s3112_s11, 6 }
   0xd   : > { %p214_p8 = scmp.lt.s32.totalorder (!%p169_p7), %s3240_s4, 4356  ;;  %s204_s3 = sand.u32 (!%p169_p7), 1, %s3104_s9  }
   0xe   : > { %s2281_s5 = sshll.u32 (!%p169_p7), %s204_s3, 9 }
   0xf   : > { %s3393_s6 = scalar_lea.vmem (!%p169_p7), [#allocation2], %s2281_s5  }
  0x11   : > { %v2904_v0 = vld [vmem:[%s4185_s1 + $0x38] sm:$0xff]  ;;  %vm1254_vm0 = vcmask 1042432   ;;  %vm1255_vm1 = vcmask 1043456   ;;  %v547_v2 = vld [vmem:[%s4185_s1 + $0xa8] sm:$0xf]  ;;  %v3154_v3 = vmov 65535  }
  0x12   : > { %v3220_v1 = vld [vmem:[%s4185_s1 + $0x78] sm:$0xff]  ;;  %v1256_v4 = vsel %vm1254_vm0, 4294967295, %v3154_v3  ;;  %1261 = vmatpush.bf16.msra.mxu0 %v2904_v0  ;;  %2921 = vmatpush.bf16.msra.mxu3 %v2904_v0  ;;  %v2903_v5 = vld [vmem:[%s4185_s1 + $0x30] sm:$0xff]  ;;  %v1113_v6 = vunpack.c.l.b16 %v547_v2  ;;  %v2902_v11 = vld [vmem:[%s4185_s1 + $0x28] sm:$0xff]  ;;  %s215_s23 = scalar_select %p214_p8, %s3240_s4, 4356  ;;  %vm1157_vm2 = vcmask 711680  }
  0x13   : > { %1430 = vmatpush.bf16.msra.mxu1 %v3220_v1  ;;  %v3232_v7 = vld [vmem:[%s4185_s1 + $0x70] sm:$0xff]  ;;  %v1257_v8 = vsel %vm1255_vm1, %v1256_v4, 0  ;;  %v3246_v12 = vld [vmem:[%s4185_s1 + $0x68] sm:$0xff]  ;;  %v3252_v13 = vld [vmem:[%s4185_s1 + $0xa0] sm:$0xff]  ;;  %vm248_vm3 = vcmask 64512   ;;  %s1905_s9 = ssub.s32 (%p3203_p3), 4357, %s3240_s4 }
  0x14   : > { %v1135_v9 = vpack.c.b16 %v1113_v6, %v1113_v6  ;;  %v2901_v14 = vld [vmem:[%s4185_s1 + $0x20] sm:$0xff]  ;;  %v3268_v16 = vld [vmem:[%s4185_s1 + $0x98] sm:$0xff]  ;;  %v3282_v19 = vld [vmem:[%s4185_s1 + $0x90] sm:$0xff]  ;;  %s2943_s30 = smul.u32 12, %s215_s23  ;;  %s2918_s7 = sshll.u32 (%p3203_p3), %s3112_s11, 9 }
  0x15   : > { %v3262_v15 = vld [vmem:[%s4185_s1 + $0x60] sm:$0xff]  ;;  %v2900_v17 = vld [vmem:[%s4185_s1 + $0x18] sm:$0xff]  ;;  %v2899_v20 = vld [vmem:[%s4185_s1 + $0x10] sm:$0xff]  ;;  %p1906_p9 = scmp.lt.s32.totalorder (%p3203_p3), %s1905_s9, 64  ;;  %s4044_s16 = scalar_lea.vmem (%p3203_p3), %s4186_s2, %s2918_s7  }
  0x16   : > { %1262 = vmatpush.bf16.msra.mxu0 %v2903_v5  ;;  %2922 = vmatpush.bf16.msra.mxu3 %v2903_v5  ;;  %v3234_v10 = vand.u32 %v1257_v8, %v1135_v9  ;;  %v2908_v18 = vld [vmem:[%s4185_s1 + $0x58] sm:$0xff]  ;;  %v2907_v21 = vld [vmem:[%s4185_s1 + $0x50] sm:$0xff]  ;;  %v3294_v22 = vld [vmem:[%s4185_s1 + $0x88] sm:$0xff]  ;;  %s3299_s20 = scalar_lea.vmem %s4184_s0, %s2943_s30 }
  0x17   : > { %1431 = vmatpush.bf16.msra.mxu1 %v3232_v7  ;;  %v2898_v23 = vld [vmem:[%s4185_s1 + $0x8] sm:$0xff]  ;;  %v3311_v25 = vld [vmem:[%s4185_s1 + $0x80] sm:$0xff]  ;;  %v2803_v27 = vld [vmem:[%s3299_s20 + $0x10] sm:$0xf0] }
  0x18   : > { %1601 = vmatpush.bf16.msra.mxu2 %v3234_v10  ;;  %v2906_v24 = vld [vmem:[%s4185_s1 + $0x48] sm:$0xff]  ;;  %v2897_v28 = vld [vmem:[%s4185_s1] sm:$0xff]  ;;  %v2288_v36 = vld [vmem:[%s3299_s20 + $0xc] sm:$0xf0] }
  0x19   : > { %v2294_v26 = vld [vmem:[%s3299_s20 + $0x8] sm:$0xf]  ;;  %v2286_v29 = vld [vmem:[%s3299_s20] sm:$0xf]  ;;  %v2802_v30 = vld [vmem:[%s3299_s20 + $0x8] sm:$0xf0] }
  0x1a   : > { %1263 = vmatpush.bf16.msra.mxu0 %v2902_v11  ;;  %2923 = vmatpush.bf16.msra.mxu3 %v2902_v11  ;;  %v2574_v31 = vld [vmem:[%s3299_s20 + $0x240] sm:$0xf]  ;;  %v2874_v32 = vld [vmem:[%s3299_s20 + $0x248] sm:$0xf0]  ;;  %v2295_v33 = vor.u32 %v2803_v27, %v2294_v26  ;;  %v2801_v35 = vld [vmem:[%s3299_s20 + $0x4] sm:$0xf]  ;;  %v2287_v37 = vor.u32 %v2802_v30, %v2286_v29 }
  0x1b   : > { %1432 = vmatpush.bf16.msra.mxu1 %v3246_v12  ;;  %v2905_v34 = vld [vmem:[%s4185_s1 + $0x40] sm:$0xff]  ;;  %v2575_v38 = vor.u32 %v2874_v32, %v2574_v31  ;;  %v2291_v39 = vor.u32 %v2801_v35, %v2288_v36  ;;  %v2806_v41 = vld [vmem:[%s3299_s20 + $0x28] sm:$0xf0]  ;;  %v2298_v42 = vld [vmem:[%s3299_s20 + $0x18] sm:$0xf] }
  0x1c   : > { %1602 = vmatpush.bf16.msra.mxu2 %v3252_v13  ;;  %v2306_v40 = vld [vmem:[%s3299_s20 + $0x20] sm:$0xf]  ;;  %v2805_v43 = vld [vmem:[%s3299_s20 + $0x20] sm:$0xf0]  ;;  %v2586_v44 = vld [vmem:[%s3299_s20 + $0x258] sm:$0xf] }
  0x1d   : > { %v2877_v45 = vld [vmem:[%s3299_s20 + $0x260] sm:$0xf0]  ;;  %v2307_v46 = vor.u32 %v2806_v41, %v2306_v40  ;;  %v2804_v47 = vld [vmem:[%s3299_s20 + $0x1c] sm:$0xf]  ;;  %v2300_v48 = vld [vmem:[%s3299_s20 + $0x24] sm:$0xf0]  ;;  %v2299_v49 = vor.u32 %v2805_v43, %v2298_v42 }
  0x1e   : > { %1264 = vmatpush.bf16.msra.mxu0 %v2901_v14  ;;  %2924 = vmatpush.bf16.msra.mxu3 %v2901_v14  ;;  %v2587_v50 = vor.u32 %v2877_v45, %v2586_v44  ;;  %v2303_v51 = vor.u32 %v2804_v47, %v2300_v48  ;;  %v2318_v52 = vld [vmem:[%s3299_s20 + $0x38] sm:$0xf]  ;;  %v2809_v53 = vld [vmem:[%s3299_s20 + $0x40] sm:$0xf0]  ;;  %v2310_v54 = vld [vmem:[%s3299_s20 + $0x30] sm:$0xf] }
  0x1f   : > { %1433 = vmatpush.bf16.msra.mxu1 %v3262_v15  ;;  %v2808_v55 = vld [vmem:[%s3299_s20 + $0x38] sm:$0xf0]  ;;  %v2598_v56 = vld [vmem:[%s3299_s20 + $0x270] sm:$0xf]  ;;  %v2319_v58 = vor.u32 %v2809_v53, %v2318_v52  ;;  %v2807_v59 = vld [vmem:[%s3299_s20 + $0x34] sm:$0xf] }
  0x20   : > { %1603 = vmatpush.bf16.msra.mxu2 %v3268_v16  ;;  %v2880_v57 = vld [vmem:[%s3299_s20 + $0x278] sm:$0xf0]  ;;  %v2312_v60 = vld [vmem:[%s3299_s20 + $0x3c] sm:$0xf0]  ;;  %v2311_v61 = vor.u32 %v2808_v55, %v2310_v54  ;;  %v2330_v0 = vld [vmem:[%s3299_s20 + $0x50] sm:$0xf] }
  0x21   : > { %v2599_v62 = vor.u32 %v2880_v57, %v2598_v56  ;;  %v2315_v63 = vor.u32 %v2807_v59, %v2312_v60  ;;  %v2322_v2 = vld [vmem:[%s3299_s20 + $0x48] sm:$0xf]  ;;  %v2811_v3 = vld [vmem:[%s3299_s20 + $0x50] sm:$0xf0]  ;;  %v2324_v8 = vld [vmem:[%s3299_s20 + $0x54] sm:$0xf0] }
  0x22   : > { %1265 = vmatpush.bf16.msra.mxu0 %v2900_v17  ;;  %2925 = vmatpush.bf16.msra.mxu3 %v2900_v17  ;;  %v2610_v4 = vld [vmem:[%s3299_s20 + $0x288] sm:$0xf]  ;;  %v2883_v5 = vld [vmem:[%s3299_s20 + $0x290] sm:$0xf0]  ;;  %v2323_v9 = vor.u32 %v2811_v3, %v2322_v2  ;;  %v2334_v14 = vld [vmem:[%s3299_s20 + $0x60] sm:$0xf] }
  0x23   : > { %1434 = vmatpush.bf16.msra.mxu1 %v2908_v18  ;;  %v2886_v17 = vld [vmem:[%s3299_s20 + $0x2a8] sm:$0xf0]  ;;  %v2346_v26 = vld [vmem:[%s3299_s20 + $0x78] sm:$0xf]  ;;  %v2817_v27 = vld [vmem:[%s3299_s20 + $0x80] sm:$0xf0] }
  0x24   : > { %1604 = vmatpush.bf16.msra.mxu2 %v3282_v19  ;;  %v2889_v29 = vld [vmem:[%s3299_s20 + $0x2c0] sm:$0xf0]  ;;  %v2816_v31 = vld [vmem:[%s3299_s20 + $0x7c] sm:$0xf]  ;;  %v2348_v32 = vld [vmem:[%s3299_s20 + $0x84] sm:$0xf0] }
  0x25   : > { %v2351_v35 = vor.u32 %v2816_v31, %v2348_v32  ;;  %v2366_v36 = vld [vmem:[%s3299_s20 + $0x98] sm:$0xf]  ;;  %v2646_v40 = vld [vmem:[%s3299_s20 + $0x2d0] sm:$0xf]  ;;  %v2892_v41 = vld [vmem:[%s3299_s20 + $0x2d8] sm:$0xf0] }
  0x26   : > { %1266 = vmatpush.bf16.msra.mxu0 %v2899_v20  ;;  %2926 = vmatpush.bf16.msra.mxu3 %v2899_v20  ;;  %v2336_v20 = vld [vmem:[%s3299_s20 + $0x6c] sm:$0xf0]  ;;  %v2819_v43 = vld [vmem:[%s3299_s20 + $0x94] sm:$0xf]  ;;  %v2360_v44 = vld [vmem:[%s3299_s20 + $0x9c] sm:$0xf0] }
  0x27   : > { %1435 = vmatpush.bf16.msra.mxu1 %v2907_v21  ;;  %v3155_v47 = vmov 0.0   ;;  %v2363_v48 = vor.u32 %v2819_v43, %v2360_v44  ;;  %v2823_v52 = vld [vmem:[%s3299_s20 + $0xb0] sm:$0xf0]  ;;  %v2658_v53 = vld [vmem:[%s3299_s20 + $0x2e8] sm:$0xf] }
  0x28   : > { %1605 = vmatpush.bf16.msra.mxu2 %v3294_v22  ;;  %249 = vst.msk [vmem:[%s3393_s6] sm:$0xff] %vm248_vm3, %v3155_v47  ;;  %v2895_v54 = vld [vmem:[%s3299_s20 + $0x2f0] sm:$0xf0]  ;;  %v2822_v56 = vld [vmem:[%s3299_s20 + $0xac] sm:$0xf] }
  0x29   : > { %250 = vst.msk [vmem:[%s3393_s6 + $0x8] sm:$0xff] %vm248_vm3, %v3155_v47  ;;  %v2372_v57 = vld [vmem:[%s3299_s20 + $0xb4] sm:$0xf0]  ;;  %v2659_v59 = vor.u32 %v2895_v54, %v2658_v53  ;;  %v2826_v2 = vld [vmem:[%s3299_s20 + $0xc8] sm:$0xf0] }
  0x2a   : > { %1267 = vmatpush.bf16.msra.mxu0 %v2898_v23  ;;  %2927 = vmatpush.bf16.msra.mxu3 %v2898_v23  ;;  %251 = vst.msk [vmem:[%s3393_s6 + $0x10] sm:$0xff] %vm248_vm3, %v3155_v47  ;;  %v2375_v60 = vor.u32 %v2822_v56, %v2372_v57  ;;  %v2879_v54 = vld [vmem:[%s3299_s20 + $0x274] sm:$0xf] }
  0x2b   : > { %1436 = vmatpush.bf16.msra.mxu1 %v2906_v24  ;;  %252 = vst.msk [vmem:[%s3393_s6 + $0x18] sm:$0xff] %vm248_vm3, %v3155_v47 }
  0x2c   : > { %1606 = vmatpush.bf16.msra.mxu2 %v3311_v25  ;;  %253 = vst.msk [vmem:[%s3393_s6 + $0x20] sm:$0xff] %vm248_vm3, %v3155_v47 }
  0x2d   : > { %254 = vst.msk [vmem:[%s3393_s6 + $0x28] sm:$0xff] %vm248_vm3, %v3155_v47 }
  0x2e   : > { %1268 = vmatpush.bf16.msra.mxu0 %v2897_v28  ;;  %2928 = vmatpush.bf16.msra.mxu3 %v2897_v28  ;;  %v2634_v28 = vld [vmem:[%s3299_s20 + $0x2b8] sm:$0xf]  ;;  %255 = vst.msk [vmem:[%s3393_s6 + $0x30] sm:$0xff] %vm248_vm3, %v3155_v47 }
  0x2f   : > { %2752 = vmatmul.msk.bf16.vlgmr.msra.gmra.mxu2 %vm1157_vm2, %v2295_v33  ;;  %1437 = vmatpush.bf16.msra.mxu1 %v2905_v34  ;;  %v2347_v33 = vor.u32 %v2817_v27, %v2346_v26  ;;  %256 = vst.msk [vmem:[%s3393_s6 + $0x38] sm:$0xff] %vm248_vm3, %v3155_v47  ;;  %v2828_v27 = vld [vmem:[%s3299_s20 + $0xdc] sm:$0xf] }
  0x30   : > { %257 = vst.msk [vmem:[%s3393_s6 + $0x40] sm:$0xff] %vm248_vm3, %v3155_v47 }
  0x31   : > { %1269 = vmatmul.bf16.vlgmr.msra.gmra.mxu0 %v2287_v37  ;;  %1389 = vmatmul.bf16.vlgmr.msra.gmra.mxu3 %v2575_v38  ;;  %v2821_v37 = vld [vmem:[%s3299_s20 + $0xa0] sm:$0xf0]  ;;  %v2358_v38 = vld [vmem:[%s3299_s20 + $0x90] sm:$0xf]  ;;  %258 = vst.msk [vmem:[%s3393_s6 + $0x48] sm:$0xff] %vm248_vm3, %v3155_v47 }
  0x32   : > { %2929 = vmatpush.bf16.msrb.mxu3 %v3220_v1  ;;  %1438 = vmatmul.bf16.vlgmr.msra.gmra.mxu1 %v2291_v39  ;;  %v2812_v1 = vld [vmem:[%s3299_s20 + $0x58] sm:$0xf0]  ;;  %v2367_v42 = vor.u32 %v2821_v37, %v2366_v36  ;;  %259 = vst.msk [vmem:[%s3393_s6 + $0x50] sm:$0xff] %vm248_vm3, %v3155_v47  ;;  %v315_v44 = vld [vmem:[%s3393_s6 + $0x10] sm:$0xff] }
  0x33   : > { %v2331_v6 = vor.u32 %v2812_v1, %v2330_v0  ;;  %v2820_v39 = vld [vmem:[%s3299_s20 + $0x98] sm:$0xf0]  ;;  %260 = vst.msk [vmem:[%s3393_s6 + $0x58] sm:$0xff] %vm248_vm3, %v3155_v47  ;;  %v2576_v0 = vld [vmem:[%s3299_s20 + $0x24c] sm:$0xf0] }
  0x34   : > { %v2359_v45 = vor.u32 %v2820_v39, %v2358_v38  ;;  %261 = vst.msk [vmem:[%s3393_s6 + $0x60] sm:$0xff] %vm248_vm3, %v3155_v47  ;;  %v2382_v1 = vld [vmem:[%s3299_s20 + $0xc0] sm:$0xf] }
  0x35   : > { %262 = vst.msk [vmem:[%s3393_s6 + $0x68] sm:$0xff] %vm248_vm3, %v3155_v47 }
  0x36   : > { %2930 = vmatpush.bf16.msrb.mxu3 %v3232_v7  ;;  %v2810_v7 = vld [vmem:[%s3299_s20 + $0x4c] sm:$0xf]  ;;  %263 = vst.msk [vmem:[%s3393_s6 + $0x70] sm:$0xff] %vm248_vm3, %v3155_v47 }
  0x37   : > { %v2327_v11 = vor.u32 %v2810_v7, %v2324_v8  ;;  %264 = vst.msk [vmem:[%s3393_s6 + $0x78] sm:$0xff] %vm248_vm3, %v3155_v47 }
  0x38   : > { %265 = vst.msk [vmem:[%s3393_s6 + $0x80] sm:$0xff] %vm248_vm3, %v3155_v47 }
  0x39   : > { %266 = vst.msk [vmem:[%s3393_s6 + $0x88] sm:$0xff] %vm248_vm3, %v3155_v47 }
  0x3a   : > { %2931 = vmatpush.bf16.msrb.mxu3 %v3246_v12  ;;  %v2342_v12 = vld [vmem:[%s3299_s20 + $0x68] sm:$0xf]  ;;  %267 = vst.msk [vmem:[%s3393_s6 + $0x90] sm:$0xff] %vm248_vm3, %v3155_v47 }
  0x3b   : > { %268 = vst.msk [vmem:[%s3393_s6 + $0x98] sm:$0xff] %vm248_vm3, %v3155_v47 }
  0x3c   : > { %269 = vst.msk [vmem:[%s3393_s6 + $0xa0] sm:$0xff] %vm248_vm3, %v3155_v47 }
  0x3d   : > { %270 = vst.msk [vmem:[%s3393_s6 + $0xa8] sm:$0xff] %vm248_vm3, %v3155_v47 }
  0x3e   : > { %2932 = vmatpush.bf16.msrb.mxu3 %v3262_v15  ;;  %v2814_v15 = vld [vmem:[%s3299_s20 + $0x68] sm:$0xf0]  ;;  %271 = vst.msk [vmem:[%s3393_s6 + $0xb0] sm:$0xff] %vm248_vm3, %v3155_v47 }
  0x3f   : > { %2753 = vmatmul.msk.bf16.gmra.mxu2 %vm1157_vm2, %v2307_v46  ;;  %v2647_v46 = vor.u32 %v2892_v41, %v2646_v40  ;;  %272 = vst.msk [vmem:[%s3393_s6 + $0xb8] sm:$0xff] %vm248_vm3, %v3155_v47  ;;  %v314_v41 = vld [vmem:[%s3393_s6 + $0x8] sm:$0xff] }
  0x40   : > { %273 = vst.msk [vmem:[%s3393_s6 + $0xc0] sm:$0xff] %vm248_vm3, %v3155_v47 }
  0x41   : > { %1274 = vmatmul.bf16.gmra.mxu0 %v2299_v49  ;;  %1394 = vmatmul.bf16.gmra.mxu3 %v2587_v50  ;;  %v2378_v49 = vld [vmem:[%s3299_s20 + $0xb0] sm:$0xf]  ;;  %v2824_v50 = vld [vmem:[%s3299_s20 + $0xb8] sm:$0xf0]  ;;  %274 = vst.msk [vmem:[%s3393_s6 + $0xc8] sm:$0xff] %vm248_vm3, %v3155_v47 }
  0x42   : > { %2933 = vmatpush.bf16.msrb.mxu3 %v2908_v18  ;;  %1443 = vmatmul.bf16.gmra.mxu1 %v2303_v51  ;;  %v2370_v51 = vld [vmem:[%s3299_s20 + $0xa8] sm:$0xf]  ;;  %v2379_v55 = vor.u32 %v2824_v50, %v2378_v49  ;;  %275 = vst.msk [vmem:[%s3393_s6 + $0xd0] sm:$0xff] %vm248_vm3, %v3155_v47  ;;  %v2406_v49 = vld [vmem:[%s3299_s20 + $0xf0] sm:$0xf] }
  0x43   : > { %276 = vst.msk [vmem:[%s3393_s6 + $0xd8] sm:$0xff] %vm248_vm3, %v3155_v47  ;;  %v2832_v50 = vld [vmem:[%s3299_s20 + $0xf8] sm:$0xf0] }
  0x44   : > { %277 = vst.msk [vmem:[%s3393_s6 + $0xe0] sm:$0xff] %vm248_vm3, %v3155_v47 }
  0x45   : > { %278 = vst.msk [vmem:[%s3393_s6 + $0xe8] sm:$0xff] %vm248_vm3, %v3155_v47 }
  0x46   : > { %2934 = vmatpush.bf16.msrb.mxu3 %v2907_v21  ;;  %v2335_v21 = vor.u32 %v2814_v15, %v2334_v14  ;;  %279 = vst.msk [vmem:[%s3393_s6 + $0xf0] sm:$0xff] %vm248_vm3, %v3155_v47 }
  0x47   : > { %280 = vst.msk [vmem:[%s3393_s6 + $0xf8] sm:$0xff] %vm248_vm3, %v3155_v47 }
  0x48   : > { %281 = vst.msk [vmem:[%s3393_s6 + $0x100] sm:$0xff] %vm248_vm3, %v3155_v47 }
  0x49   : > { %282 = vst.msk [vmem:[%s3393_s6 + $0x108] sm:$0xff] %vm248_vm3, %v3155_v47 }
  0x4a   : > { %2935 = vmatpush.bf16.msrb.mxu3 %v2906_v24  ;;  %v2354_v24 = vld [vmem:[%s3299_s20 + $0x80] sm:$0xf]  ;;  %283 = vst.msk [vmem:[%s3393_s6 + $0x110] sm:$0xff] %vm248_vm3, %v3155_v47 }
  0x4b   : > { %284 = vst.msk [vmem:[%s3393_s6 + $0x118] sm:$0xff] %vm248_vm3, %v3155_v47 }
  0x4c   : > { %285 = vst.msk [vmem:[%s3393_s6 + $0x120] sm:$0xff] %vm248_vm3, %v3155_v47 }
  0x4d   : > { %286 = vst.msk [vmem:[%s3393_s6 + $0x128] sm:$0xff] %vm248_vm3, %v3155_v47 }
  0x4e   : > { %2936 = vmatpush.bf16.msrb.mxu3 %v2905_v34  ;;  %v2635_v34 = vor.u32 %v2889_v29, %v2634_v28  ;;  %287 = vst.msk [vmem:[%s3393_s6 + $0x130] sm:$0xff] %vm248_vm3, %v3155_v47  ;;  %v2396_v28 = vld [vmem:[%s3299_s20 + $0xe4] sm:$0xf0] }
  0x4f   : > { %2754 = vmatmul.msk.bf16.gmra.mxu2 %vm1157_vm2, %v2319_v58  ;;  %v2371_v58 = vor.u32 %v2823_v52, %v2370_v51  ;;  %288 = vst.msk [vmem:[%s3393_s6 + $0x138] sm:$0xff] %vm248_vm3, %v3155_v47  ;;  %v316_v52 = vld [vmem:[%s3393_s6 + $0x18] sm:$0xff] }
  0x50   : > { %289 = vst.msk [vmem:[%s3393_s6 + $0x140] sm:$0xff] %vm248_vm3, %v3155_v47 }
  0x51   : > { %1279 = vmatmul.bf16.gmra.mxu0 %v2311_v61  ;;  %1399 = vmatmul.bf16.gmra.mxu3 %v2599_v62  ;;  %v2390_v61 = vld [vmem:[%s3299_s20 + $0xc8] sm:$0xf]  ;;  %v2827_v62 = vld [vmem:[%s3299_s20 + $0xd0] sm:$0xf0]  ;;  %290 = vst.msk [vmem:[%s3393_s6 + $0x148] sm:$0xff] %vm248_vm3, %v3155_v47 }
  0x52   : > { %2937 = vmatpush.bf16.msra.mxu3 %v3234_v10  ;;  %1448 = vmatmul.bf16.gmra.mxu1 %v2315_v63  ;;  %v2611_v10 = vor.u32 %v2883_v5, %v2610_v4  ;;  %v2873_v63 = vld [vmem:[%s3299_s20 + $0x244] sm:$0xf]  ;;  %v2391_v3 = vor.u32 %v2827_v62, %v2390_v61  ;;  %v2384_v5 = vld [vmem:[%s3299_s20 + $0xcc] sm:$0xf0]  ;;  %291 = vst.msk [vmem:[%s3393_s6 + $0x150] sm:$0xff] %vm248_vm3, %v3155_v47 }
  0x53   : > { %v2825_v4 = vld [vmem:[%s3299_s20 + $0xc4] sm:$0xf]  ;;  %v2579_v7 = vor.u32 %v2873_v63, %v2576_v0  ;;  %292 = vst.msk [vmem:[%s3393_s6 + $0x158] sm:$0xff] %vm248_vm3, %v3155_v47  ;;  %v2407_v63 = vor.u32 %v2832_v50, %v2406_v49  ;;  %v2838_v49 = vld [vmem:[%s3299_s20 + $0x128] sm:$0xf0] }
  0x54   : > { %293 = vst.msk [vmem:[%s3393_s6 + $0x160] sm:$0xff] %vm248_vm3, %v3155_v47  ;;  %v2885_v50 = vld [vmem:[%s3299_s20 + $0x2a4] sm:$0xf] }
  0x55   : > { %294 = vst.msk [vmem:[%s3393_s6 + $0x168] sm:$0xff] %vm248_vm3, %v3155_v47 }
  0x56   : > { %2938 = vmatpush.bf16.msra.mxu3 %v3252_v13  ;;  %v2815_v13 = vld [vmem:[%s3299_s20 + $0x70] sm:$0xf0]  ;;  %295 = vst.msk [vmem:[%s3393_s6 + $0x170] sm:$0xff] %vm248_vm3, %v3155_v47 }
  0x57   : > { %v2343_v18 = vor.u32 %v2815_v13, %v2342_v12  ;;  %v313_v12 = vld [vmem:[%s3393_s6] sm:$0xff]  ;;  %296 = vst.msk [vmem:[%s3393_s6 + $0x178] sm:$0xff] %vm248_vm3, %v3155_v47 }
  0x58   : > { %297 = vst.msk [vmem:[%s3393_s6 + $0x180] sm:$0xff] %vm248_vm3, %v3155_v47 }
  0x59   : > { %298 = vst.msk [vmem:[%s3393_s6 + $0x188] sm:$0xff] %vm248_vm3, %v3155_v47 }
  0x5a   : > { %2939 = vmatpush.bf16.msra.mxu3 %v3268_v16  ;;  %v2622_v16 = vld [vmem:[%s3299_s20 + $0x2a0] sm:$0xf]  ;;  %299 = vst.msk [vmem:[%s3393_s6 + $0x190] sm:$0xff] %vm248_vm3, %v3155_v47 }
  0x5b   : > { %300 = vst.msk [vmem:[%s3393_s6 + $0x198] sm:$0xff] %vm248_vm3, %v3155_v47 }
  0x5c   : > { %301 = vst.msk [vmem:[%s3393_s6 + $0x1a0] sm:$0xff] %vm248_vm3, %v3155_v47 }
  0x5d   : > { %302 = vst.msk [vmem:[%s3393_s6 + $0x1a8] sm:$0xff] %vm248_vm3, %v3155_v47 }
  0x5e   : > { %2940 = vmatpush.bf16.msra.mxu3 %v3282_v19  ;;  %v2813_v19 = vld [vmem:[%s3299_s20 + $0x64] sm:$0xf]  ;;  %303 = vst.msk [vmem:[%s3393_s6 + $0x1b0] sm:$0xff] %vm248_vm3, %v3155_v47 }
  0x5f   : > { %2755 = vmatmul.msk.bf16.gmra.mxu2 %vm1157_vm2, %v2331_v6  ;;  %v2339_v23 = vor.u32 %v2813_v19, %v2336_v20  ;;  %v2383_v6 = vor.u32 %v2826_v2, %v2382_v1  ;;  %v2402_v19 = vld [vmem:[%s3299_s20 + $0xe0] sm:$0xf]  ;;  %v2830_v20 = vld [vmem:[%s3299_s20 + $0xe8] sm:$0xf0]  ;;  %304 = vst.msk [vmem:[%s3393_s6 + $0x1b8] sm:$0xff] %vm248_vm3, %v3155_v47 }
  0x60   : > { %v2403_v26 = vor.u32 %v2830_v20, %v2402_v19  ;;  %305 = vst.msk [vmem:[%s3393_s6 + $0x1c0] sm:$0xff] %vm248_vm3, %v3155_v47  ;;  %v2882_v19 = vld [vmem:[%s3299_s20 + $0x28c] sm:$0xf]  ;;  %v2612_v20 = vld [vmem:[%s3299_s20 + $0x294] sm:$0xf0] }
  0x61   : > { %1284 = vmatmul.bf16.gmra.mxu0 %v2323_v9  ;;  %1404 = vmatmul.bf16.gmra.mxu3 %v2611_v10  ;;  %v2387_v9 = vor.u32 %v2825_v4, %v2384_v5  ;;  %306 = vst.msk [vmem:[%s3393_s6 + $0x1c8] sm:$0xff] %vm248_vm3, %v3155_v47 }
  0x62   : > { %2941 = vmatpush.bf16.msra.mxu3 %v3294_v22  ;;  %1453 = vmatmul.bf16.gmra.mxu1 %v2327_v11  ;;  %v2623_v22 = vor.u32 %v2886_v17, %v2622_v16  ;;  %307 = vst.msk [vmem:[%s3393_s6 + $0x1d0] sm:$0xff] %vm248_vm3, %v3155_v47 }
  0x63   : > { %308 = vst.msk [vmem:[%s3393_s6 + $0x1d8] sm:$0xff] %vm248_vm3, %v3155_v47 }
  0x64   : > { %309 = vst.msk [vmem:[%s3393_s6 + $0x1e0] sm:$0xff] %vm248_vm3, %v3155_v47 }
  0x65   : > { %310 = vst.msk [vmem:[%s3393_s6 + $0x1e8] sm:$0xff] %vm248_vm3, %v3155_v47 }
  0x66   : > { %2942 = vmatpush.bf16.msra.mxu3 %v3311_v25  ;;  %v2818_v25 = vld [vmem:[%s3299_s20 + $0x88] sm:$0xf0]  ;;  %311 = vst.msk [vmem:[%s3393_s6 + $0x1f0] sm:$0xff] %vm248_vm3, %v3155_v47 }
  0x67   : > { %v2355_v30 = vor.u32 %v2818_v25, %v2354_v24  ;;  %v2394_v24 = vld [vmem:[%s3299_s20 + $0xd8] sm:$0xf]  ;;  %v2829_v25 = vld [vmem:[%s3299_s20 + $0xe0] sm:$0xf0]  ;;  %312 = vst.msk [vmem:[%s3393_s6 + $0x1f8] sm:$0xff] %vm248_vm3, %v3155_v47  ;;  %v317_v47 = vld [vmem:[%s3393_s6 + $0x20] sm:$0xff] }
  0x6f   : > { %2756 = vmatmul.msk.bf16.gmra.mxu2 %vm1157_vm2, %v2343_v18 }
  0x71   : > { %1289 = vmatmul.bf16.gmra.mxu0 %v2335_v21  ;;  %1409 = vmatmul.bf16.gmra.mxu3 %v2623_v22  ;;  %v2876_v21 = vld [vmem:[%s3299_s20 + $0x25c] sm:$0xf]  ;;  %v2588_v22 = vld [vmem:[%s3299_s20 + $0x264] sm:$0xf0] }
  0x72   : > { %1458 = vmatmul.bf16.gmra.mxu1 %v2339_v23  ;;  %v2591_v31 = vor.u32 %v2876_v21, %v2588_v22 }
  0x7f   : > { %2757 = vmatmul.msk.bf16.gmra.mxu2 %vm1157_vm2, %v2355_v30  ;;  %v2395_v30 = vor.u32 %v2829_v25, %v2394_v24  ;;  %v2420_v24 = vld [vmem:[%s3299_s20 + $0x114] sm:$0xf0] }
  0x81   : > { %1294 = vmatmul.bf16.gmra.mxu0 %v2347_v33  ;;  %1414 = vmatmul.bf16.gmra.mxu3 %v2635_v34  ;;  %v2399_v33 = vor.u32 %v2828_v27, %v2396_v28  ;;  %v2615_v28 = vor.u32 %v2882_v19, %v2612_v20  ;;  %v2840_v20 = vld [vmem:[%s3299_s20 + $0x13c] sm:$0xf] }
  0x82   : > { %1463 = vmatmul.bf16.gmra.mxu1 %v2351_v35 }
  0x8f   : > { %2758 = vmatmul.msk.bf16.gmra.mxu2 %vm1157_vm2, %v2367_v42 }
  0x91   : > { %1299 = vmatmul.bf16.gmra.mxu0 %v2359_v45  ;;  %1419 = vmatmul.bf16.gmra.mxu3 %v2647_v46  ;;  %v2414_v46 = vld [vmem:[%s3299_s20 + $0xf8] sm:$0xf] }
  0x92   : > { %1468 = vmatmul.bf16.gmra.mxu1 %v2363_v48  ;;  %v2833_v48 = vld [vmem:[%s3299_s20 + $0x100] sm:$0xf0] }
  0x9f   : > { %2759 = vmatmul.msk.bf16.gmra.mxu2 %vm1157_vm2, %v2379_v55  ;;  %v2600_v55 = vld [vmem:[%s3299_s20 + $0x27c] sm:$0xf0] }
  0xa0   : > { %v2603_v0 = vor.u32 %v2879_v54, %v2600_v55  ;;  %v2837_v54 = vld [vmem:[%s3299_s20 + $0x124] sm:$0xf]  ;;  %v2432_v55 = vld [vmem:[%s3299_s20 + $0x12c] sm:$0xf0] }
  0xa1   : > { %1304 = vmatmul.bf16.gmra.mxu0 %v2371_v58  ;;  %1424 = vmatmul.bf16.gmra.mxu3 %v2659_v59  ;;  %v2415_v58 = vor.u32 %v2833_v48, %v2414_v46  ;;  %v2831_v59 = vld [vmem:[%s3299_s20 + $0xf4] sm:$0xf]  ;;  %v2430_v46 = vld [vmem:[%s3299_s20 + $0x120] sm:$0xf] }
  0xa2   : > { %1473 = vmatmul.bf16.gmra.mxu1 %v2375_v60  ;;  %v2408_v60 = vld [vmem:[%s3299_s20 + $0xfc] sm:$0xf0] }
  0xa3   : > { %v2411_v2 = vor.u32 %v2831_v59, %v2408_v60 }
  0xae   : > { %v1270_v8 = vpop.f32.mrf.mxu0 }
  0xaf   : > { %2760 = vmatmul.msk.bf16.gmra.mxu2 %vm1157_vm2, %v2391_v3  ;;  %v1439_v10 = vpop.f32.mrf.mxu1 }
  0xb0   : > { %v1440_v11 = vadd.f32 %v1439_v10, %v1270_v8 }
  0xb1   : > { %1309 = vmatmul.bf16.gmra.mxu0 %v2383_v6  ;;  %1558 = vmatmul.bf16.vlgmr.msrb.gmra.mxu3 %v2579_v7 }
  0xb2   : > { %v1608_v13 = vpop.f32.mrf.mxu2  ;;  %1478 = vmatmul.bf16.gmra.mxu1 %v2387_v9 }
  0xb3   : > { %v1609_v14 = vadd.f32 %v1608_v13, %v1440_v11  ;;  %v2836_v13 = vld [vmem:[%s3299_s20 + $0x118] sm:$0xf0] }
  0xb4   : > { %v3535_v15 = vpop.f32.mrf.mxu3 }
  0xb5   : > { %v1768_v16 = vadd.f32 %v1609_v14, %v313_v12  ;;  %v2426_v12 = vld [vmem:[%s3299_s20 + $0x110] sm:$0xf]  ;;  %v318_v14 = vld [vmem:[%s3393_s6 + $0x28] sm:$0xff] }
  0xb6   : > { %v1272_v17 = vpop.f32.mrf.mxu0  ;;  %v2427_v22 = vor.u32 %v2836_v13, %v2426_v12  ;;  %v2442_v12 = vld [vmem:[%s3299_s20 + $0x138] sm:$0xf] }
  0xb7   : > { %1833 = vst.msk [vmem:[%s3393_s6] sm:$0xff] %vm248_vm3, %v1768_v16  ;;  %v1441_v18 = vpop.f32.mrf.mxu1  ;;  %v2418_v16 = vld [vmem:[%s3299_s20 + $0x108] sm:$0xf] }
  0xb8   : > { %v1442_v35 = vadd.f32 %v1441_v18, %v1272_v17  ;;  %v2835_v18 = vld [vmem:[%s3299_s20 + $0x110] sm:$0xf0] }
  0xb9   : > { %v2419_v27 = vor.u32 %v2835_v18, %v2418_v16  ;;  %v2888_v16 = vld [vmem:[%s3299_s20 + $0x2bc] sm:$0xf] }
  0xba   : > { %v1610_v23 = vpop.f32.mrf.mxu2 }
  0xbb   : > { %v1611_v39 = vadd.f32 %v1610_v23, %v1442_v35  ;;  %v2834_v23 = vld [vmem:[%s3299_s20 + $0x10c] sm:$0xf] }
  0xbc   : > { %v3568_v29 = vpop.f32.mrf.mxu3 }
  0xbd   : > { %v1769_v51 = vadd.f32 %v1611_v39, %v314_v41 }
  0xbe   : > { %v1275_v32 = vpop.f32.mrf.mxu0 }
  0xbf   : > { %2761 = vmatmul.msk.bf16.gmra.mxu2 %vm1157_vm2, %v2403_v26  ;;  %v1444_v34 = vpop.f32.mrf.mxu1  ;;  %1834 = vst.msk [vmem:[%s3393_s6 + $0x8] sm:$0xff] %vm248_vm3, %v1769_v51  ;;  %v2624_v51 = vld [vmem:[%s3299_s20 + $0x2ac] sm:$0xf0] }
  0xc0   : > { %v1445_v37 = vadd.f32 %v1444_v34, %v1275_v32  ;;  %v319_v34 = vld [vmem:[%s3393_s6 + $0x30] sm:$0xff]  ;;  %v2627_v59 = vor.u32 %v2885_v50, %v2624_v51 }
  0xc1   : > { %1314 = vmatmul.bf16.gmra.mxu0 %v2395_v30  ;;  %1563 = vmatmul.bf16.gmra.mxu3 %v2591_v31  ;;  %v2423_v31 = vor.u32 %v2834_v23, %v2420_v24  ;;  %v2648_v50 = vld [vmem:[%s3299_s20 + $0x2dc] sm:$0xf0] }
  0xc2   : > { %v1613_v36 = vpop.f32.mrf.mxu2  ;;  %1483 = vmatmul.bf16.gmra.mxu1 %v2399_v33 }
  0xc3   : > { %v1614_v42 = vadd.f32 %v1613_v36, %v1445_v37 }
  0xc4   : > { %v3595_v38 = vpop.f32.mrf.mxu3 }
  0xc5   : > { %v1770_v56 = vadd.f32 %v1614_v42, %v315_v44  ;;  %v2839_v44 = vld [vmem:[%s3299_s20 + $0x130] sm:$0xf0] }
  0xc6   : > { %v1277_v40 = vpop.f32.mrf.mxu0 }
  0xc7   : > { %v1446_v43 = vpop.f32.mrf.mxu1  ;;  %1835 = vst.msk [vmem:[%s3393_s6 + $0x10] sm:$0xff] %vm248_vm3, %v1770_v56 }
  0xc8   : > { %v1447_v45 = vadd.f32 %v1446_v43, %v1277_v40  ;;  %v2438_v43 = vld [vmem:[%s3299_s20 + $0x128] sm:$0xf] }
  0xca   : > { %v1615_v53 = vpop.f32.mrf.mxu2 }
  0xcb   : > { %v1616_v57 = vadd.f32 %v1615_v53, %v1447_v45  ;;  %v320_v45 = vld [vmem:[%s3393_s6 + $0x38] sm:$0xff]  ;;  %v2439_v53 = vor.u32 %v2839_v44, %v2438_v43  ;;  %v2845_v43 = vld [vmem:[%s3299_s20 + $0x160] sm:$0xf0] }
  0xcc   : > { %v3632_v61 = vpop.f32.mrf.mxu3  ;;  %v324_v44 = vld [vmem:[%s3393_s6 + $0x58] sm:$0xff] }
  0xcd   : > { %v1771_v62 = vadd.f32 %v1616_v57, %v316_v52 }
  0xce   : > { %v1280_v1 = vpop.f32.mrf.mxu0 }
  0xcf   : > { %2762 = vmatmul.msk.bf16.gmra.mxu2 %vm1157_vm2, %v2415_v58  ;;  %v1449_v3 = vpop.f32.mrf.mxu1  ;;  %1836 = vst.msk [vmem:[%s3393_s6 + $0x18] sm:$0xff] %vm248_vm3, %v1771_v62  ;;  %v2431_v58 = vor.u32 %v2838_v49, %v2430_v46  ;;  %v2435_v62 = vor.u32 %v2837_v54, %v2432_v55  ;;  %v2891_v49 = vld [vmem:[%s3299_s20 + $0x2d4] sm:$0xf]  ;;  %v2456_v54 = vld [vmem:[%s3299_s20 + $0x15c] sm:$0xf0] }
  0xd0   : > { %v1450_v4 = vadd.f32 %v1449_v3, %v1280_v1  ;;  %v321_v1 = vld [vmem:[%s3393_s6 + $0x40] sm:$0xff] }
  0xd1   : > { %1319 = vmatmul.bf16.gmra.mxu0 %v2407_v63  ;;  %1568 = vmatmul.bf16.gmra.mxu3 %v2603_v0 }
  0xd2   : > { %v1618_v5 = vpop.f32.mrf.mxu2  ;;  %1488 = vmatmul.bf16.gmra.mxu1 %v2411_v2 }
  0xd3   : > { %v1619_v6 = vadd.f32 %v1618_v5, %v1450_v4 }
  0xd4   : > { %v3645_v7 = vpop.f32.mrf.mxu3 }
  0xd5   : > { %v1772_v8 = vadd.f32 %v1619_v6, %v317_v47 }
  0xd6   : > { %v1282_v9 = vpop.f32.mrf.mxu0 }
  0xd7   : > { %1837 = vst.msk [vmem:[%s3393_s6 + $0x20] sm:$0xff] %vm248_vm3, %v1772_v8  ;;  %v1451_v10 = vpop.f32.mrf.mxu1 }
  0xd8   : > { %v1452_v11 = vadd.f32 %v1451_v10, %v1282_v9  ;;  %v2450_v9 = vld [vmem:[%s3299_s20 + $0x140] sm:$0xf]  ;;  %v2842_v10 = vld [vmem:[%s3299_s20 + $0x148] sm:$0xf0] }
  0xd9   : > { %v2451_v19 = vor.u32 %v2842_v10, %v2450_v9  ;;  %v2474_v10 = vld [vmem:[%s3299_s20 + $0x170] sm:$0xf] }
  0xda   : > { %v1620_v17 = vpop.f32.mrf.mxu2 }
  0xdb   : > { %v1621_v21 = vadd.f32 %v1620_v17, %v1452_v11  ;;  %v322_v11 = vld [vmem:[%s3393_s6 + $0x48] sm:$0xff]  ;;  %v2636_v17 = vld [vmem:[%s3299_s20 + $0x2c4] sm:$0xf0] }
  0xdc   : > { %v3658_v25 = vpop.f32.mrf.mxu3 }
  0xdd   : > { %v1773_v26 = vadd.f32 %v1621_v21, %v318_v14  ;;  %v2841_v14 = vld [vmem:[%s3299_s20 + $0x140] sm:$0xf0]  ;;  %v2444_v21 = vld [vmem:[%s3299_s20 + $0x144] sm:$0xf0] }
  0xde   : > { %v1285_v30 = vpop.f32.mrf.mxu0  ;;  %v2443_v24 = vor.u32 %v2841_v14, %v2442_v12  ;;  %v326_v12 = vld [vmem:[%s3393_s6 + $0x68] sm:$0xff] }
  0xdf   : > { %1838 = vst.msk [vmem:[%s3393_s6 + $0x28] sm:$0xff] %vm248_vm3, %v1773_v26  ;;  %2763 = vmatmul.msk.bf16.gmra.mxu2 %vm1157_vm2, %v2427_v22  ;;  %v1454_v32 = vpop.f32.mrf.mxu1  ;;  %v2639_v26 = vor.u32 %v2888_v16, %v2636_v17  ;;  %v2847_v16 = vld [vmem:[%s3299_s20 + $0x170] sm:$0xf0]  ;;  %v2894_v17 = vld [vmem:[%s3299_s20 + $0x2ec] sm:$0xf] }
  0xe0   : > { %v1455_v33 = vadd.f32 %v1454_v32, %v1285_v30  ;;  %v323_v32 = vld [vmem:[%s3393_s6 + $0x50] sm:$0xff] }
  0xe1   : > { %1324 = vmatmul.bf16.gmra.mxu0 %v2419_v27  ;;  %1573 = vmatmul.bf16.gmra.mxu3 %v2615_v28  ;;  %v2447_v28 = vor.u32 %v2840_v20, %v2444_v21  ;;  %v2846_v21 = vld [vmem:[%s3299_s20 + $0x16c] sm:$0xf] }
  0xe2   : > { %v1623_v35 = vpop.f32.mrf.mxu2  ;;  %1493 = vmatmul.bf16.gmra.mxu1 %v2423_v31 }
  0xe3   : > { %v1624_v36 = vadd.f32 %v1623_v35, %v1455_v33 }
  0xe4   : > { %v3664_v37 = vpop.f32.mrf.mxu3 }
  0xe5   : > { %v1774_v39 = vadd.f32 %v1624_v36, %v319_v34 }
  0xe6   : > { %v1287_v40 = vpop.f32.mrf.mxu0 }
  0xe7   : > { %1839 = vst.msk [vmem:[%s3393_s6 + $0x30] sm:$0xff] %vm248_vm3, %v1774_v39  ;;  %v1456_v41 = vpop.f32.mrf.mxu1 }
  0xe8   : > { %v1457_v42 = vadd.f32 %v1456_v41, %v1287_v40 }
  0xea   : > { %v1625_v48 = vpop.f32.mrf.mxu2 }
  0xeb   : > { %v1626_v52 = vadd.f32 %v1625_v48, %v1457_v42  ;;  %v2462_v42 = vld [vmem:[%s3299_s20 + $0x158] sm:$0xf]  ;;  %v2844_v48 = vld [vmem:[%s3299_s20 + $0x158] sm:$0xf0] }
  0xec   : > { %v3677_v56 = vpop.f32.mrf.mxu3 }
  0xed   : > { %v1775_v57 = vadd.f32 %v1626_v52, %v320_v45  ;;  %v2454_v45 = vld [vmem:[%s3299_s20 + $0x150] sm:$0xf]  ;;  %v2463_v52 = vor.u32 %v2845_v43, %v2462_v42 }
  0xee   : > { %v1290_v60 = vpop.f32.mrf.mxu0 }
  0xef   : > { %1840 = vst.msk [vmem:[%s3393_s6 + $0x38] sm:$0xff] %vm248_vm3, %v1775_v57  ;;  %2764 = vmatmul.msk.bf16.gmra.mxu2 %vm1157_vm2, %v2439_v53  ;;  %v1459_v63 = vpop.f32.mrf.mxu1  ;;  %v2843_v53 = vld [vmem:[%s3299_s20 + $0x154] sm:$0xf] }
  0xf0   : > { %v1460_v0 = vadd.f32 %v1459_v63, %v1290_v60 }
  0xf1   : > { %1329 = vmatmul.bf16.gmra.mxu0 %v2431_v58  ;;  %1578 = vmatmul.bf16.gmra.mxu3 %v2627_v59  ;;  %v2455_v58 = vor.u32 %v2844_v48, %v2454_v45  ;;  %v2651_v59 = vor.u32 %v2891_v49, %v2648_v50  ;;  %v2486_v45 = vld [vmem:[%s3299_s20 + $0x188] sm:$0xf]  ;;  %v2478_v49 = vld [vmem:[%s3299_s20 + $0x180] sm:$0xf] }
  0xf2   : > { %v1628_v2 = vpop.f32.mrf.mxu2  ;;  %1498 = vmatmul.bf16.gmra.mxu1 %v2435_v62  ;;  %v2459_v62 = vor.u32 %v2843_v53, %v2456_v54  ;;  %v328_v48 = vld [vmem:[%s3393_s6 + $0x78] sm:$0xff] }
  0xf3   : > { %v1629_v3 = vadd.f32 %v1628_v2, %v1460_v0  ;;  %v2878_v53 = vld [vmem:[%s3299_s20 + $0x268] sm:$0xf0] }
  0xf4   : > { %v3683_v4 = vpop.f32.mrf.mxu3 }
  0xf5   : > { %v1776_v47 = vadd.f32 %v1629_v3, %v321_v1  ;;  %v325_v1 = vld [vmem:[%s3393_s6 + $0x60] sm:$0xff] }
  0xf6   : > { %v1292_v5 = vpop.f32.mrf.mxu0 }
  0xf7   : > { %1841 = vst.msk [vmem:[%s3393_s6 + $0x40] sm:$0xff] %vm248_vm3, %v1776_v47  ;;  %v1461_v6 = vpop.f32.mrf.mxu1 }
  0xf8   : > { %v1462_v8 = vadd.f32 %v1461_v6, %v1292_v5 }
  0xfa   : > { %v1630_v13 = vpop.f32.mrf.mxu2 }
  0xfb   : > { %v1631_v18 = vadd.f32 %v1630_v13, %v1462_v8  ;;  %v2466_v13 = vld [vmem:[%s3299_s20 + $0x168] sm:$0xf] }
  0xfc   : > { %v3696_v22 = vpop.f32.mrf.mxu3 }
  0xfd   : > { %v1777_v23 = vadd.f32 %v1631_v18, %v322_v11  ;;  %v2848_v11 = vld [vmem:[%s3299_s20 + $0x178] sm:$0xf0]  ;;  %v2660_v18 = vld [vmem:[%s3299_s20 + $0x2f4] sm:$0xf0] }
  0xfe   : > { %v1295_v27 = vpop.f32.mrf.mxu0  ;;  %v2475_v20 = vor.u32 %v2848_v11, %v2474_v10 }
  0xff   : > { %1842 = vst.msk [vmem:[%s3393_s6 + $0x48] sm:$0xff] %vm248_vm3, %v1777_v23  ;;  %2765 = vmatmul.msk.bf16.gmra.mxu2 %vm1157_vm2, %v2451_v19  ;;  %v1464_v30 = vpop.f32.mrf.mxu1  ;;  %v2468_v23 = vld [vmem:[%s3299_s20 + $0x174] sm:$0xf0] }
 0x100   : > { %v1465_v31 = vadd.f32 %v1464_v30, %v1295_v27  ;;  %v2467_v27 = vor.u32 %v2847_v16, %v2466_v13  ;;  %v2498_v16 = vld [vmem:[%s3299_s20 + $0x1a0] sm:$0xf] }
 0x101   : > { %1334 = vmatmul.bf16.gmra.mxu0 %v2443_v24  ;;  %1583 = vmatmul.bf16.gmra.mxu3 %v2639_v26 }
 0x102   : > { %v1633_v33 = vpop.f32.mrf.mxu2  ;;  %1503 = vmatmul.bf16.gmra.mxu1 %v2447_v28  ;;  %v2663_v28 = vor.u32 %v2894_v17, %v2660_v18  ;;  %v2854_v17 = vld [vmem:[%s3299_s20 + $0x1a8] sm:$0xf0]  ;;  %v330_v18 = vld [vmem:[%s3393_s6 + $0x88] sm:$0xff] }
 0x103   : > { %v1634_v34 = vadd.f32 %v1633_v33, %v1465_v31  ;;  %v2471_v31 = vor.u32 %v2846_v21, %v2468_v23  ;;  %v2853_v21 = vld [vmem:[%s3299_s20 + $0x1a0] sm:$0xf0]  ;;  %v2606_v23 = vld [vmem:[%s3299_s20 + $0x278] sm:$0xf] }
 0x104   : > { %v3702_v35 = vpop.f32.mrf.mxu3 }
 0x105   : > { %v1778_v36 = vadd.f32 %v1634_v34, %v323_v32  ;;  %v327_v34 = vld [vmem:[%s3393_s6 + $0x70] sm:$0xff] }
 0x106   : > { %v1297_v39 = vpop.f32.mrf.mxu0 }
 0x107   : > { %1843 = vst.msk [vmem:[%s3393_s6 + $0x50] sm:$0xff] %vm248_vm3, %v1778_v36  ;;  %v1466_v40 = vpop.f32.mrf.mxu1 }
 0x108   : > { %v1467_v41 = vadd.f32 %v1466_v40, %v1297_v39 }
 0x10a   : > { %v1635_v46 = vpop.f32.mrf.mxu2 }
 0x10b   : > { %v1636_v51 = vadd.f32 %v1635_v46, %v1467_v41  ;;  %v2851_v46 = vld [vmem:[%s3299_s20 + $0x190] sm:$0xf0] }
 0x10c   : > { %v3715_v55 = vpop.f32.mrf.mxu3 }
 0x10d   : > { %v1779_v57 = vadd.f32 %v1636_v51, %v324_v44  ;;  %v2850_v51 = vld [vmem:[%s3299_s20 + $0x188] sm:$0xf0] }
 0x10e   : > { %v1300_v60 = vpop.f32.mrf.mxu0 }
 0x10f   : > { %1844 = vst.msk [vmem:[%s3393_s6 + $0x58] sm:$0xff] %vm248_vm3, %v1779_v57  ;;  %2766 = vmatmul.msk.bf16.gmra.mxu2 %vm1157_vm2, %v2463_v52  ;;  %v1469_v63 = vpop.f32.mrf.mxu1  ;;  %v2594_v52 = vld [vmem:[%s3299_s20 + $0x260] sm:$0xf]  ;;  %v2487_v57 = vor.u32 %v2851_v46, %v2486_v45 }
 0x110   : > { %v1470_v0 = vadd.f32 %v1469_v63, %v1300_v60  ;;  %v2479_v63 = vor.u32 %v2850_v51, %v2478_v49 }
 0x111   : > { %1339 = vmatmul.bf16.gmra.mxu0 %v2455_v58  ;;  %1588 = vmatmul.bf16.gmra.mxu3 %v2651_v59  ;;  %v2849_v58 = vld [vmem:[%s3299_s20 + $0x184] sm:$0xf]  ;;  %v2480_v59 = vld [vmem:[%s3299_s20 + $0x18c] sm:$0xf0] }
 0x112   : > { %v1638_v2 = vpop.f32.mrf.mxu2  ;;  %1508 = vmatmul.bf16.gmra.mxu1 %v2459_v62 }
 0x113   : > { %v1639_v3 = vadd.f32 %v1638_v2, %v1470_v0  ;;  %v2595_v0 = vor.u32 %v2878_v53, %v2594_v52  ;;  %v2483_v2 = vor.u32 %v2849_v58, %v2480_v59  ;;  %v2510_v53 = vld [vmem:[%s3299_s20 + $0x1b8] sm:$0xf]  ;;  %v2502_v58 = vld [vmem:[%s3299_s20 + $0x1b0] sm:$0xf] }
 0x114   : > { %v3721_v47 = vpop.f32.mrf.mxu3 }
 0x115   : > { %v1780_v5 = vadd.f32 %v1639_v3, %v325_v1 }
 0x116   : > { %v1302_v6 = vpop.f32.mrf.mxu0 }
 0x117   : > { %1845 = vst.msk [vmem:[%s3393_s6 + $0x60] sm:$0xff] %vm248_vm3, %v1780_v5  ;;  %v1471_v8 = vpop.f32.mrf.mxu1 }
 0x118   : > { %v1472_v9 = vadd.f32 %v1471_v8, %v1302_v6  ;;  %v329_v6 = vld [vmem:[%s3393_s6 + $0x80] sm:$0xff] }
 0x11a   : > { %v1640_v14 = vpop.f32.mrf.mxu2 }
 0x11b   : > { %v1641_v19 = vadd.f32 %v1640_v14, %v1472_v9 }
 0x11c   : > { %v3734_v24 = vpop.f32.mrf.mxu3 }
 0x11d   : > { %v1781_v26 = vadd.f32 %v1641_v19, %v326_v12  ;;  %v2490_v19 = vld [vmem:[%s3299_s20 + $0x198] sm:$0xf] }
 0x11e   : > { %v1305_v30 = vpop.f32.mrf.mxu0 }
 0x11f   : > { %1846 = vst.msk [vmem:[%s3393_s6 + $0x68] sm:$0xff] %vm248_vm3, %v1781_v26  ;;  %2767 = vmatmul.msk.bf16.gmra.mxu2 %vm1157_vm2, %v2475_v20  ;;  %v1474_v32 = vpop.f32.mrf.mxu1  ;;  %v2881_v26 = vld [vmem:[%s3299_s20 + $0x280] sm:$0xf0] }
 0x120   : > { %v1475_v33 = vadd.f32 %v1474_v32, %v1305_v30  ;;  %v2852_v30 = vld [vmem:[%s3299_s20 + $0x19c] sm:$0xf] }
 0x121   : > { %1344 = vmatmul.bf16.gmra.mxu0 %v2467_v27  ;;  %1593 = vmatmul.bf16.gmra.mxu3 %v2663_v28  ;;  %v2499_v28 = vor.u32 %v2854_v17, %v2498_v16  ;;  %v333_v17 = vld [vmem:[%s3393_s6 + $0xa0] sm:$0xff] }
 0x122   : > { %v1643_v36 = vpop.f32.mrf.mxu2  ;;  %1513 = vmatmul.bf16.gmra.mxu1 %v2471_v31  ;;  %v2492_v31 = vld [vmem:[%s3299_s20 + $0x1a4] sm:$0xf0] }
 0x123   : > { %v1644_v39 = vadd.f32 %v1643_v36, %v1475_v33  ;;  %v2607_v36 = vor.u32 %v2881_v26, %v2606_v23 }
 0x124   : > { %v3740_v40 = vpop.f32.mrf.mxu3 }
 0x125   : > { %v1782_v41 = vadd.f32 %v1644_v39, %v327_v34  ;;  %v2491_v34 = vor.u32 %v2853_v21, %v2490_v19 }
 0x126   : > { %v1307_v42 = vpop.f32.mrf.mxu0 }
 0x127   : > { %1847 = vst.msk [vmem:[%s3393_s6 + $0x70] sm:$0xff] %vm248_vm3, %v1782_v41  ;;  %v1476_v43 = vpop.f32.mrf.mxu1  ;;  %v2495_v41 = vor.u32 %v2852_v30, %v2492_v31  ;;  %v2860_v30 = vld [vmem:[%s3299_s20 + $0x1d8] sm:$0xf0] }
 0x128   : > { %v1477_v44 = vadd.f32 %v1476_v43, %v1307_v42  ;;  %v334_v31 = vld [vmem:[%s3393_s6 + $0xa8] sm:$0xff] }
 0x12a   : > { %v1645_v50 = vpop.f32.mrf.mxu2 }
 0x12b   : > { %v1646_v54 = vadd.f32 %v1645_v50, %v1477_v44  ;;  %v331_v44 = vld [vmem:[%s3393_s6 + $0x90] sm:$0xff] }
 0x12c   : > { %v3753_v60 = vpop.f32.mrf.mxu3 }
 0x12d   : > { %v1783_v62 = vadd.f32 %v1646_v54, %v328_v48  ;;  %v2857_v54 = vld [vmem:[%s3299_s20 + $0x1c0] sm:$0xf0] }
 0x12e   : > { %v1310_v1 = vpop.f32.mrf.mxu0 }
 0x12f   : > { %1848 = vst.msk [vmem:[%s3393_s6 + $0x78] sm:$0xff] %vm248_vm3, %v1783_v62  ;;  %2768 = vmatmul.msk.bf16.gmra.mxu2 %vm1157_vm2, %v2487_v57  ;;  %v1479_v3 = vpop.f32.mrf.mxu1  ;;  %v332_v57 = vld [vmem:[%s3393_s6 + $0x98] sm:$0xff]  ;;  %v2856_v62 = vld [vmem:[%s3299_s20 + $0x1b8] sm:$0xf0] }
 0x130   : > { %v1480_v5 = vadd.f32 %v1479_v3, %v1310_v1  ;;  %v2855_v3 = vld [vmem:[%s3299_s20 + $0x1b4] sm:$0xf] }
 0x131   : > { %1349 = vmatmul.bf16.gmra.mxu0 %v2479_v63  ;;  %2777 = vmatmul.msk.bf16.vlgmr.msra.gmra.mxu3 %vm1157_vm2, %v2595_v0  ;;  %v2618_v63 = vld [vmem:[%s3299_s20 + $0x290] sm:$0xf]  ;;  %v2884_v0 = vld [vmem:[%s3299_s20 + $0x298] sm:$0xf0] }
 0x132   : > { %v1648_v8 = vpop.f32.mrf.mxu2  ;;  %1518 = vmatmul.bf16.gmra.mxu1 %v2483_v2  ;;  %v2511_v2 = vor.u32 %v2857_v54, %v2510_v53 }
 0x133   : > { %v1649_v9 = vadd.f32 %v1648_v8, %v1480_v5  ;;  %v2504_v5 = vld [vmem:[%s3299_s20 + $0x1bc] sm:$0xf0] }
 0x134   : > { %v3760_v10 = vpop.f32.mrf.mxu3 }
 0x135   : > { %v1784_v11 = vadd.f32 %v1649_v9, %v329_v6  ;;  %v2503_v9 = vor.u32 %v2856_v62, %v2502_v58  ;;  %v335_v58 = vld [vmem:[%s3393_s6 + $0xb0] sm:$0xff] }
 0x136   : > { %v1312_v12 = vpop.f32.mrf.mxu0 }
 0x137   : > { %1849 = vst.msk [vmem:[%s3393_s6 + $0x80] sm:$0xff] %vm248_vm3, %v1784_v11  ;;  %v1481_v13 = vpop.f32.mrf.mxu1  ;;  %v2619_v11 = vor.u32 %v2884_v0, %v2618_v63 }
 0x138   : > { %v1482_v14 = vadd.f32 %v1481_v13, %v1312_v12  ;;  %v2507_v13 = vor.u32 %v2855_v3, %v2504_v5  ;;  %v2534_v5 = vld [vmem:[%s3299_s20 + $0x1e8] sm:$0xf] }
 0x13a   : > { %v1650_v20 = vpop.f32.mrf.mxu2 }
 0x13b   : > { %v1651_v27 = vadd.f32 %v1650_v20, %v1482_v14 }
 0x13c   : > { %v3773_v32 = vpop.f32.mrf.mxu3 }
 0x13d   : > { %v1785_v33 = vadd.f32 %v1651_v27, %v330_v18 }
 0x13e   : > { %v1315_v39 = vpop.f32.mrf.mxu0 }
 0x13f   : > { %1850 = vst.msk [vmem:[%s3393_s6 + $0x88] sm:$0xff] %vm248_vm3, %v1785_v33  ;;  %2769 = vmatmul.msk.bf16.gmra.mxu2 %vm1157_vm2, %v2499_v28  ;;  %v1484_v42 = vpop.f32.mrf.mxu1  ;;  %v2522_v28 = vld [vmem:[%s3299_s20 + $0x1d0] sm:$0xf]  ;;  %v2514_v33 = vld [vmem:[%s3299_s20 + $0x1c8] sm:$0xf] }
 0x140   : > { %v1485_v43 = vadd.f32 %v1484_v42, %v1315_v39  ;;  %v2630_v39 = vld [vmem:[%s3299_s20 + $0x2a8] sm:$0xf] }
 0x141   : > { %1354 = vmatmul.bf16.gmra.mxu0 %v2491_v34  ;;  %2778 = vmatmul.msk.bf16.gmra.mxu3 %vm1157_vm2, %v2607_v36  ;;  %v2859_v36 = vld [vmem:[%s3299_s20 + $0x1d0] sm:$0xf0] }
 0x142   : > { %v1653_v45 = vpop.f32.mrf.mxu2  ;;  %1523 = vmatmul.bf16.gmra.mxu1 %v2495_v41  ;;  %v2887_v41 = vld [vmem:[%s3299_s20 + $0x2b0] sm:$0xf0] }
 0x143   : > { %v1654_v46 = vadd.f32 %v1653_v45, %v1485_v43  ;;  %v2523_v43 = vor.u32 %v2860_v30, %v2522_v28  ;;  %v2516_v45 = vld [vmem:[%s3299_s20 + $0x1d4] sm:$0xf0] }
 0x144   : > { %v3780_v48 = vpop.f32.mrf.mxu3 }
 0x145   : > { %v1786_v49 = vadd.f32 %v1654_v46, %v331_v44  ;;  %v2858_v44 = vld [vmem:[%s3299_s20 + $0x1cc] sm:$0xf] }
 0x146   : > { %v1317_v50 = vpop.f32.mrf.mxu0  ;;  %v2519_v53 = vor.u32 %v2858_v44, %v2516_v45 }
 0x147   : > { %1851 = vst.msk [vmem:[%s3393_s6 + $0x90] sm:$0xff] %vm248_vm3, %v1786_v49  ;;  %v1486_v51 = vpop.f32.mrf.mxu1 }
 0x148   : > { %v1487_v52 = vadd.f32 %v1486_v51, %v1317_v50  ;;  %v2515_v50 = vor.u32 %v2859_v36, %v2514_v33  ;;  %v2631_v51 = vor.u32 %v2887_v41, %v2630_v39  ;;  %v337_v36 = vld [vmem:[%s3393_s6 + $0xc0] sm:$0xff] }
 0x14a   : > { %v1655_v59 = vpop.f32.mrf.mxu2 }
 0x14b   : > { %v1656_v1 = vadd.f32 %v1655_v59, %v1487_v52 }
 0x14c   : > { %v3793_v6 = vpop.f32.mrf.mxu3 }
 0x14d   : > { %v1787_v8 = vadd.f32 %v1656_v1, %v332_v57 }
 0x14e   : > { %v1320_v12 = vpop.f32.mrf.mxu0 }
 0x14f   : > { %1852 = vst.msk [vmem:[%s3393_s6 + $0x98] sm:$0xff] %vm248_vm3, %v1787_v8  ;;  %2770 = vmatmul.msk.bf16.gmra.mxu2 %vm1157_vm2, %v2511_v2  ;;  %v1489_v14 = vpop.f32.mrf.mxu1  ;;  %v2863_v8 = vld [vmem:[%s3299_s20 + $0x1f0] sm:$0xf0] }
 0x150   : > { %v1490_v16 = vadd.f32 %v1489_v14, %v1320_v12  ;;  %v2642_v14 = vld [vmem:[%s3299_s20 + $0x2c0] sm:$0xf] }
 0x151   : > { %1359 = vmatmul.bf16.gmra.mxu0 %v2503_v9  ;;  %2779 = vmatmul.msk.bf16.gmra.mxu3 %vm1157_vm2, %v2619_v11  ;;  %v336_v9 = vld [vmem:[%s3393_s6 + $0xb8] sm:$0xff]  ;;  %v2526_v11 = vld [vmem:[%s3299_s20 + $0x1e0] sm:$0xf] }
 0x152   : > { %v1658_v18 = vpop.f32.mrf.mxu2  ;;  %1528 = vmatmul.bf16.gmra.mxu1 %v2507_v13  ;;  %v2862_v13 = vld [vmem:[%s3299_s20 + $0x1e8] sm:$0xf0] }
 0x153   : > { %v1659_v19 = vadd.f32 %v1658_v18, %v1490_v16  ;;  %v2890_v16 = vld [vmem:[%s3299_s20 + $0x2c8] sm:$0xf0]  ;;  %v2535_v18 = vor.u32 %v2863_v8, %v2534_v5 }
 0x154   : > { %v3800_v20 = vpop.f32.mrf.mxu3  ;;  %v2643_v28 = vor.u32 %v2890_v16, %v2642_v14  ;;  %v339_v16 = vld [vmem:[%s3393_s6 + $0xd0] sm:$0xff] }
 0x155   : > { %v1788_v21 = vadd.f32 %v1659_v19, %v333_v17  ;;  %v2861_v19 = vld [vmem:[%s3299_s20 + $0x1e4] sm:$0xf] }
 0x156   : > { %v1322_v23 = vpop.f32.mrf.mxu0 }
 0x157   : > { %1853 = vst.msk [vmem:[%s3393_s6 + $0xa0] sm:$0xff] %vm248_vm3, %v1788_v21  ;;  %v1491_v26 = vpop.f32.mrf.mxu1  ;;  %v2528_v21 = vld [vmem:[%s3299_s20 + $0x1ec] sm:$0xf0] }
 0x158   : > { %v1492_v27 = vadd.f32 %v1491_v26, %v1322_v23 }
 0x15a   : > { %v1660_v34 = vpop.f32.mrf.mxu2 }
 0x15b   : > { %v1661_v42 = vadd.f32 %v1660_v34, %v1492_v27  ;;  %v2527_v27 = vor.u32 %v2862_v13, %v2526_v11 }
 0x15c   : > { %v3813_v46 = vpop.f32.mrf.mxu3 }
 0x15d   : > { %v1789_v49 = vadd.f32 %v1661_v42, %v334_v31  ;;  %v2531_v31 = vor.u32 %v2861_v19, %v2528_v21 }
 0x15e   : > { %v1325_v52 = vpop.f32.mrf.mxu0 }
 0x15f   : > { %1854 = vst.msk [vmem:[%s3393_s6 + $0xa8] sm:$0xff] %vm248_vm3, %v1789_v49  ;;  %2771 = vmatmul.msk.bf16.gmra.mxu2 %vm1157_vm2, %v2523_v43  ;;  %v1494_v54 = vpop.f32.mrf.mxu1 }
 0x160   : > { %v1495_v57 = vadd.f32 %v1494_v54, %v1325_v52  ;;  %v338_v52 = vld [vmem:[%s3393_s6 + $0xc8] sm:$0xff] }
 0x161   : > { %1364 = vmatmul.bf16.gmra.mxu0 %v2515_v50  ;;  %2780 = vmatmul.msk.bf16.gmra.mxu3 %vm1157_vm2, %v2631_v51  ;;  %v2546_v50 = vld [vmem:[%s3299_s20 + $0x200] sm:$0xf]  ;;  %v2866_v51 = vld [vmem:[%s3299_s20 + $0x208] sm:$0xf0] }
 0x162   : > { %v1663_v59 = vpop.f32.mrf.mxu2  ;;  %1533 = vmatmul.bf16.gmra.mxu1 %v2519_v53  ;;  %v2538_v53 = vld [vmem:[%s3299_s20 + $0x1f8] sm:$0xf] }
 0x163   : > { %v1664_v62 = vadd.f32 %v1663_v59, %v1495_v57  ;;  %v2865_v57 = vld [vmem:[%s3299_s20 + $0x200] sm:$0xf0] }
 0x164   : > { %v3820_v63 = vpop.f32.mrf.mxu3  ;;  %v2893_v59 = vld [vmem:[%s3299_s20 + $0x2e0] sm:$0xf0]  ;;  %v2539_v8 = vor.u32 %v2865_v57, %v2538_v53 }
 0x165   : > { %v1790_v0 = vadd.f32 %v1664_v62, %v335_v58  ;;  %v2654_v58 = vld [vmem:[%s3299_s20 + $0x2d8] sm:$0xf] }
 0x166   : > { %v1327_v1 = vpop.f32.mrf.mxu0 }
 0x167   : > { %1855 = vst.msk [vmem:[%s3393_s6 + $0xb0] sm:$0xff] %vm248_vm3, %v1790_v0  ;;  %v1496_v2 = vpop.f32.mrf.mxu1  ;;  %v2547_v0 = vor.u32 %v2866_v51, %v2546_v50  ;;  %v2552_v50 = vld [vmem:[%s3299_s20 + $0x21c] sm:$0xf0] }
 0x168   : > { %v1497_v3 = vadd.f32 %v1496_v2, %v1327_v1  ;;  %v2864_v1 = vld [vmem:[%s3299_s20 + $0x1fc] sm:$0xf]  ;;  %v2540_v2 = vld [vmem:[%s3299_s20 + $0x204] sm:$0xf0] }
 0x16a   : > { %v1665_v12 = vpop.f32.mrf.mxu2 }
 0x16b   : > { %v1666_v17 = vadd.f32 %v1665_v12, %v1497_v3  ;;  %v2543_v12 = vor.u32 %v2864_v1, %v2540_v2 }
 0x16c   : > { %v3833_v23 = vpop.f32.mrf.mxu3 }
 0x16d   : > { %v1791_v26 = vadd.f32 %v1666_v17, %v336_v9  ;;  %v2655_v9 = vor.u32 %v2893_v59, %v2654_v58 }
 0x16e   : > { %v1330_v30 = vpop.f32.mrf.mxu0 }
 0x16f   : > { %1856 = vst.msk [vmem:[%s3393_s6 + $0xb8] sm:$0xff] %vm248_vm3, %v1791_v26  ;;  %2772 = vmatmul.msk.bf16.gmra.mxu2 %vm1157_vm2, %v2535_v18  ;;  %v1499_v33 = vpop.f32.mrf.mxu1 }
 0x170   : > { %v1500_v34 = vadd.f32 %v1499_v33, %v1330_v30  ;;  %v2558_v30 = vld [vmem:[%s3299_s20 + $0x218] sm:$0xf]  ;;  %v340_v33 = vld [vmem:[%s3393_s6 + $0xd8] sm:$0xff] }
 0x171   : > { %1369 = vmatmul.bf16.gmra.mxu0 %v2527_v27  ;;  %2781 = vmatmul.msk.bf16.gmra.mxu3 %vm1157_vm2, %v2643_v28 }
 0x172   : > { %v1668_v39 = vpop.f32.mrf.mxu2  ;;  %1538 = vmatmul.bf16.gmra.mxu1 %v2531_v31  ;;  %v2869_v31 = vld [vmem:[%s3299_s20 + $0x220] sm:$0xf0] }
 0x173   : > { %v1669_v41 = vadd.f32 %v1668_v39, %v1500_v34  ;;  %v2550_v34 = vld [vmem:[%s3299_s20 + $0x210] sm:$0xf]  ;;  %v2868_v39 = vld [vmem:[%s3299_s20 + $0x218] sm:$0xf0] }
 0x174   : > { %v3840_v42 = vpop.f32.mrf.mxu3  ;;  %v2551_v53 = vor.u32 %v2868_v39, %v2550_v34 }
 0x175   : > { %v1792_v43 = vadd.f32 %v1669_v41, %v337_v36  ;;  %v2666_v41 = vld [vmem:[%s3299_s20 + $0x2f0] sm:$0xf] }
 0x176   : > { %v1332_v44 = vpop.f32.mrf.mxu0 }
 0x177   : > { %1857 = vst.msk [vmem:[%s3393_s6 + $0xc0] sm:$0xff] %vm248_vm3, %v1792_v43  ;;  %v1501_v45 = vpop.f32.mrf.mxu1  ;;  %v2896_v43 = vld [vmem:[%s3299_s20 + $0x2f8] sm:$0xf0] }
 0x178   : > { %v1502_v49 = vadd.f32 %v1501_v45, %v1332_v44  ;;  %v2559_v45 = vor.u32 %v2869_v31, %v2558_v30  ;;  %v2564_v30 = vld [vmem:[%s3299_s20 + $0x234] sm:$0xf0] }
 0x17a   : > { %v1670_v54 = vpop.f32.mrf.mxu2 }
 0x17b   : > { %v1671_v62 = vadd.f32 %v1670_v54, %v1502_v49  ;;  %v2867_v49 = vld [vmem:[%s3299_s20 + $0x214] sm:$0xf]  ;;  %v2667_v54 = vor.u32 %v2896_v43, %v2666_v41 }
 0x17c   : > { %v3853_v3 = vpop.f32.mrf.mxu3  ;;  %v2555_v58 = vor.u32 %v2867_v49, %v2552_v50 }
 0x17d   : > { %v1793_v5 = vadd.f32 %v1671_v62, %v338_v52 }
 0x17e   : > { %v1335_v11 = vpop.f32.mrf.mxu0 }
 0x17f   : > { %1858 = vst.msk [vmem:[%s3393_s6 + $0xc8] sm:$0xff] %vm248_vm3, %v1793_v5  ;;  %2773 = vmatmul.msk.bf16.gmra.mxu2 %vm1157_vm2, %v2547_v0  ;;  %v1504_v13 = vpop.f32.mrf.mxu1  ;;  %v341_v0 = vld [vmem:[%s3393_s6 + $0xe0] sm:$0xff] }
 0x180   : > { %v1505_v14 = vadd.f32 %v1504_v13, %v1335_v11  ;;  %v2570_v13 = vld [vmem:[%s3299_s20 + $0x230] sm:$0xf] }
 0x181   : > { %1374 = vmatmul.bf16.gmra.mxu0 %v2539_v8  ;;  %2782 = vmatmul.msk.bf16.gmra.mxu3 %vm1157_vm2, %v2655_v9 }
 0x182   : > { %v1673_v17 = vpop.f32.mrf.mxu2  ;;  %1543 = vmatmul.bf16.gmra.mxu1 %v2543_v12 }
 0x183   : > { %v1674_v18 = vadd.f32 %v1673_v17, %v1505_v14  ;;  %v2872_v14 = vld [vmem:[%s3299_s20 + $0x238] sm:$0xf0] }
 0x184   : > { %v3860_v19 = vpop.f32.mrf.mxu3 }
 0x185   : > { %v1794_v21 = vadd.f32 %v1674_v18, %v339_v16  ;;  %v342_v16 = vld [vmem:[%s3393_s6 + $0xe8] sm:$0xff]  ;;  %v2562_v18 = vld [vmem:[%s3299_s20 + $0x228] sm:$0xf] }
 0x186   : > { %v1337_v26 = vpop.f32.mrf.mxu0 }
 0x187   : > { %1859 = vst.msk [vmem:[%s3393_s6 + $0xd0] sm:$0xff] %vm248_vm3, %v1794_v21  ;;  %v1506_v27 = vpop.f32.mrf.mxu1  ;;  %v2871_v21 = vld [vmem:[%s3299_s20 + $0x230] sm:$0xf0] }
 0x188   : > { %v1507_v28 = vadd.f32 %v1506_v27, %v1337_v26  ;;  %v2571_v27 = vor.u32 %v2872_v14, %v2570_v13  ;;  %v2563_v34 = vor.u32 %v2871_v21, %v2562_v18  ;;  %v345_v14 = vld [vmem:[%s3393_s6 + $0x100] sm:$0xff]  ;;  %v363_v21 = vld [vmem:[%s3393_s6 + $0x190] sm:$0xff] }
 0x18a   : > { %v1675_v36 = vpop.f32.mrf.mxu2 }
 0x18b   : > { %v1676_v44 = vadd.f32 %v1675_v36, %v1507_v28  ;;  %v2870_v28 = vld [vmem:[%s3299_s20 + $0x22c] sm:$0xf] }
 0x18c   : > { %v3873_v51 = vpop.f32.mrf.mxu3  ;;  %v2567_v39 = vor.u32 %v2870_v28, %v2564_v30 }
 0x18d   : > { %v1795_v52 = vadd.f32 %v1676_v44, %v340_v33  ;;  %v343_v44 = vld [vmem:[%s3393_s6 + $0xf0] sm:$0xff] }
 0x18e   : > { %v1340_v57 = vpop.f32.mrf.mxu0 }
 0x18f   : > { %1860 = vst.msk [vmem:[%s3393_s6 + $0xd8] sm:$0xff] %vm248_vm3, %v1795_v52  ;;  %2774 = vmatmul.msk.bf16.gmra.mxu2 %vm1157_vm2, %v2559_v45  ;;  %v1509_v59 = vpop.f32.mrf.mxu1 }
 0x190   : > { %v1510_v62 = vadd.f32 %v1509_v59, %v1340_v57  ;;  %v2875_v59 = vld [vmem:[%s3299_s20 + $0x250] sm:$0xf0] }
 0x191   : > { %1379 = vmatmul.bf16.gmra.mxu0 %v2551_v53  ;;  %2783 = vmatmul.msk.bf16.gmra.mxu3 %vm1157_vm2, %v2667_v54 }
 0x192   : > { %v1678_v1 = vpop.f32.mrf.mxu2  ;;  %1548 = vmatmul.bf16.gmra.mxu1 %v2555_v58  ;;  %v2582_v58 = vld [vmem:[%s3299_s20 + $0x248] sm:$0xf] }
 0x193   : > { %v1679_v2 = vadd.f32 %v1678_v1, %v1510_v62  ;;  %v344_v62 = vld [vmem:[%s3393_s6 + $0xf8] sm:$0xff] }
 0x194   : > { %v3880_v5 = vpop.f32.mrf.mxu3 }
 0x195   : > { %v1796_v8 = vadd.f32 %v1679_v2, %v341_v0  ;;  %v2583_v2 = vor.u32 %v2875_v59, %v2582_v58  ;;  %v347_v58 = vld [vmem:[%s3393_s6 + $0x110] sm:$0xff] }
 0x196   : > { %v1342_v9 = vpop.f32.mrf.mxu0 }
 0x197   : > { %1861 = vst.msk [vmem:[%s3393_s6 + $0xe0] sm:$0xff] %vm248_vm3, %v1796_v8  ;;  %v1511_v11 = vpop.f32.mrf.mxu1 }
 0x198   : > { %v1512_v12 = vadd.f32 %v1511_v11, %v1342_v9 }
 0x19a   : > { %v1680_v17 = vpop.f32.mrf.mxu2 }
 0x19b   : > { %v1681_v26 = vadd.f32 %v1680_v17, %v1512_v12  ;;  %v1565_v17 = vadd.f32 %v3780_v48, %v3595_v38  ;;  %v1567_v38 = vadd.f32 %v3793_v6, %v3632_v61  ;;  %v1570_v61 = vadd.f32 %v3800_v20, %v3645_v7 }
 0x19c   : > { %v3891_v31 = vpop.f32.mrf.mxu3  ;;  %v1572_v7 = vadd.f32 %v3813_v46, %v3658_v25  ;;  %v1575_v25 = vadd.f32 %v3820_v63, %v3664_v37  ;;  %v1577_v37 = vadd.f32 %v3833_v23, %v3677_v56  ;;  %v1580_v56 = vadd.f32 %v3840_v42, %v3683_v4 }
 0x19d   : > { %v1797_v33 = vadd.f32 %v1681_v26, %v342_v16  ;;  %v1582_v4 = vadd.f32 %v3853_v3, %v3696_v22  ;;  %v1585_v22 = vadd.f32 %v3860_v19, %v3702_v35  ;;  %v1587_v35 = vadd.f32 %v3873_v51, %v3715_v55 }
 0x19e   : > { %v1345_v36 = vpop.f32.mrf.mxu0  ;;  %v1590_v55 = vadd.f32 %v3880_v5, %v3721_v47  ;;  %v1592_v47 = vadd.f32 %v3891_v31, %v3734_v24 }
 0x19f   : > { %1862 = vst.msk [vmem:[%s3393_s6 + $0xe8] sm:$0xff] %vm248_vm3, %v1797_v33  ;;  %2775 = vmatmul.msk.bf16.gmra.mxu2 %vm1157_vm2, %v2571_v27  ;;  %v1514_v41 = vpop.f32.mrf.mxu1 }
 0x1a0   : > { %v1515_v43 = vadd.f32 %v1514_v41, %v1345_v36 }
 0x1a1   : > { %1384 = vmatmul.bf16.gmra.mxu0 %v2563_v34 }
 0x1a2   : > { %v1683_v45 = vpop.f32.mrf.mxu2  ;;  %1553 = vmatmul.bf16.gmra.mxu1 %v2567_v39  ;;  %v346_v39 = vld [vmem:[%s3393_s6 + $0x108] sm:$0xff] }
 0x1a3   : > { %v1684_v49 = vadd.f32 %v1683_v45, %v1515_v43  ;;  %v364_v43 = vld [vmem:[%s3393_s6 + $0x198] sm:$0xff] }
 0x1a4   : > { %v3897_v50 = vpop.f32.mrf.mxu3 }
 0x1a5   : > { %v1798_v52 = vadd.f32 %v1684_v49, %v343_v44  ;;  %v1595_v24 = vadd.f32 %v3897_v50, %v3740_v40 }
 0x1a6   : > { %v1347_v53 = vpop.f32.mrf.mxu0 }
 0x1a7   : > { %1863 = vst.msk [vmem:[%s3393_s6 + $0xf0] sm:$0xff] %vm248_vm3, %v1798_v52  ;;  %v1516_v54 = vpop.f32.mrf.mxu1 }
 0x1a8   : > { %v1517_v57 = vadd.f32 %v1516_v54, %v1347_v53 }
 0x1aa   : > { %v1685_v0 = vpop.f32.mrf.mxu2 }
 0x1ab   : > { %v1686_v1 = vadd.f32 %v1685_v0, %v1517_v57 }
 0x1ac   : > { %v3904_v8 = vpop.f32.mrf.mxu3 }
 0x1ad   : > { %v1799_v9 = vadd.f32 %v1686_v1, %v344_v62  ;;  %v365_v62 = vld [vmem:[%s3393_s6 + $0x1a0] sm:$0xff]  ;;  %v1597_v40 = vadd.f32 %v3904_v8, %v3753_v60 }
 0x1ae   : > { %v1350_v11 = vpop.f32.mrf.mxu0 }
 0x1af   : > { %1864 = vst.msk [vmem:[%s3393_s6 + $0xf8] sm:$0xff] %vm248_vm3, %v1799_v9  ;;  %2776 = vmatmul.msk.bf16.gmra.mxu2 %vm1157_vm2, %v2583_v2  ;;  %v1519_v12 = vpop.f32.mrf.mxu1 }
 0x1b0   : > { %v1520_v13 = vadd.f32 %v1519_v12, %v1350_v11 }
 0x1b2   : > { %v1688_v16 = vpop.f32.mrf.mxu2 }
 0x1b3   : > { %v1689_v18 = vadd.f32 %v1688_v16, %v1520_v13 }
 0x1b4   : > { %v1733_v26 = vpop.f32.mrf.mxu3 }
 0x1b5   : > { %v1800_v27 = vadd.f32 %v1689_v18, %v345_v14  ;;  %v1734_v28 = vadd.f32 %v1733_v26, %v1565_v17  ;;  %v348_v14 = vld [vmem:[%s3393_s6 + $0x118] sm:$0xff]  ;;  %v366_v17 = vld [vmem:[%s3393_s6 + $0x1a8] sm:$0xff] }
 0x1b6   : > { %v1352_v30 = vpop.f32.mrf.mxu0 }
 0x1b7   : > { %1865 = vst.msk [vmem:[%s3393_s6 + $0x100] sm:$0xff] %vm248_vm3, %v1800_v27  ;;  %v1818_v33 = vadd.f32 %v1734_v28, %v363_v21  ;;  %v1521_v34 = vpop.f32.mrf.mxu1 }
 0x1b8   : > { %v1522_v36 = vadd.f32 %v1521_v34, %v1352_v30  ;;  %v349_v34 = vld [vmem:[%s3393_s6 + $0x120] sm:$0xff] }
 0x1b9   : > { %1883 = vst.msk [vmem:[%s3393_s6 + $0x190] sm:$0xff] %vm248_vm3, %v1818_v33 }
 0x1ba   : > { %v1690_v41 = vpop.f32.mrf.mxu2 }
 0x1bb   : > { %v1691_v48 = vadd.f32 %v1690_v41, %v1522_v36 }
 0x1bc   : > { %v1735_v44 = vpop.f32.mrf.mxu3 }
 0x1bd   : > { %v1801_v45 = vadd.f32 %v1691_v48, %v346_v39  ;;  %v1736_v49 = vadd.f32 %v1735_v44, %v1567_v38  ;;  %v367_v39 = vld [vmem:[%s3393_s6 + $0x1b0] sm:$0xff] }
 0x1be   : > { %v1355_v52 = vpop.f32.mrf.mxu0 }
 0x1bf   : > { %1866 = vst.msk [vmem:[%s3393_s6 + $0x108] sm:$0xff] %vm248_vm3, %v1801_v45  ;;  %v1819_v53 = vadd.f32 %v1736_v49, %v364_v43  ;;  %v1524_v54 = vpop.f32.mrf.mxu1 }
 0x1c0   : > { %v1525_v57 = vadd.f32 %v1524_v54, %v1355_v52  ;;  %v350_v52 = vld [vmem:[%s3393_s6 + $0x128] sm:$0xff]  ;;  %v368_v54 = vld [vmem:[%s3393_s6 + $0x1b8] sm:$0xff] }
 0x1c1   : > { %1884 = vst.msk [vmem:[%s3393_s6 + $0x198] sm:$0xff] %vm248_vm3, %v1819_v53 }
 0x1c2   : > { %v1693_v59 = vpop.f32.mrf.mxu2 }
 0x1c3   : > { %v1694_v6 = vadd.f32 %v1693_v59, %v1525_v57 }
 0x1c4   : > { %v1738_v0 = vpop.f32.mrf.mxu3 }
 0x1c5   : > { %v1802_v1 = vadd.f32 %v1694_v6, %v347_v58  ;;  %v1739_v2 = vadd.f32 %v1738_v0, %v1570_v61 }
 0x1c6   : > { %v1357_v9 = vpop.f32.mrf.mxu0 }
 0x1c7   : > { %1867 = vst.msk [vmem:[%s3393_s6 + $0x110] sm:$0xff] %vm248_vm3, %v1802_v1  ;;  %v1820_v11 = vadd.f32 %v1739_v2, %v365_v62  ;;  %v1526_v12 = vpop.f32.mrf.mxu1  ;;  %v351_v1 = vld [vmem:[%s3393_s6 + $0x130] sm:$0xff] }
 0x1c8   : > { %v1527_v13 = vadd.f32 %v1526_v12, %v1357_v9  ;;  %v369_v9 = vld [vmem:[%s3393_s6 + $0x1c0] sm:$0xff] }
 0x1c9   : > { %1885 = vst.msk [vmem:[%s3393_s6 + $0x1a0] sm:$0xff] %vm248_vm3, %v1820_v11 }
 0x1ca   : > { %v1695_v16 = vpop.f32.mrf.mxu2 }
 0x1cb   : > { %v1696_v20 = vadd.f32 %v1695_v16, %v1527_v13 }
 0x1cc   : > { %v1740_v18 = vpop.f32.mrf.mxu3 }
 0x1cd   : > { %v1803_v21 = vadd.f32 %v1696_v20, %v348_v14  ;;  %v1741_v26 = vadd.f32 %v1740_v18, %v1572_v7 }
 0x1ce   : > { %v1360_v27 = vpop.f32.mrf.mxu0 }
 0x1cf   : > { %1868 = vst.msk [vmem:[%s3393_s6 + $0x118] sm:$0xff] %vm248_vm3, %v1803_v21  ;;  %v1821_v28 = vadd.f32 %v1741_v26, %v366_v17  ;;  %v1529_v30 = vpop.f32.mrf.mxu1  ;;  %v352_v17 = vld [vmem:[%s3393_s6 + $0x138] sm:$0xff]  ;;  %v370_v21 = vld [vmem:[%s3393_s6 + $0x1c8] sm:$0xff] }
 0x1d0   : > { %v1530_v33 = vadd.f32 %v1529_v30, %v1360_v27 }
 0x1d1   : > { %1886 = vst.msk [vmem:[%s3393_s6 + $0x1a8] sm:$0xff] %vm248_vm3, %v1821_v28 }
 0x1d2   : > { %v1698_v36 = vpop.f32.mrf.mxu2 }
 0x1d3   : > { %v1699_v46 = vadd.f32 %v1698_v36, %v1530_v33 }
 0x1d4   : > { %v1743_v41 = vpop.f32.mrf.mxu3 }
 0x1d5   : > { %v1804_v38 = vadd.f32 %v1699_v46, %v349_v34  ;;  %v1744_v48 = vadd.f32 %v1743_v41, %v1575_v25  ;;  %v353_v25 = vld [vmem:[%s3393_s6 + $0x140] sm:$0xff] }
 0x1d6   : > { %v1362_v43 = vpop.f32.mrf.mxu0 }
 0x1d7   : > { %1869 = vst.msk [vmem:[%s3393_s6 + $0x120] sm:$0xff] %vm248_vm3, %v1804_v38  ;;  %v1822_v44 = vadd.f32 %v1744_v48, %v367_v39  ;;  %v1531_v45 = vpop.f32.mrf.mxu1  ;;  %v371_v39 = vld [vmem:[%s3393_s6 + $0x1d0] sm:$0xff] }
 0x1d8   : > { %v1532_v49 = vadd.f32 %v1531_v45, %v1362_v43 }
 0x1d9   : > { %1887 = vst.msk [vmem:[%s3393_s6 + $0x1b0] sm:$0xff] %vm248_vm3, %v1822_v44 }
 0x1da   : > { %v1700_v53 = vpop.f32.mrf.mxu2 }
 0x1db   : > { %v1701_v63 = vadd.f32 %v1700_v53, %v1532_v49 }
 0x1dc   : > { %v1745_v57 = vpop.f32.mrf.mxu3 }
 0x1dd   : > { %v1805_v58 = vadd.f32 %v1701_v63, %v350_v52  ;;  %v1746_v59 = vadd.f32 %v1745_v57, %v1577_v37  ;;  %v354_v52 = vld [vmem:[%s3393_s6 + $0x148] sm:$0xff]  ;;  %v372_v37 = vld [vmem:[%s3393_s6 + $0x1d8] sm:$0xff] }
 0x1de   : > { %v1365_v61 = vpop.f32.mrf.mxu0 }
 0x1df   : > { %1870 = vst.msk [vmem:[%s3393_s6 + $0x128] sm:$0xff] %vm248_vm3, %v1805_v58  ;;  %v1823_v6 = vadd.f32 %v1746_v59, %v368_v54  ;;  %v1534_v62 = vpop.f32.mrf.mxu1 }
 0x1e0   : > { %v1535_v0 = vadd.f32 %v1534_v62, %v1365_v61  ;;  %v355_v62 = vld [vmem:[%s3393_s6 + $0x150] sm:$0xff] }
 0x1e1   : > { %1888 = vst.msk [vmem:[%s3393_s6 + $0x1b8] sm:$0xff] %vm248_vm3, %v1823_v6 }
 0x1e2   : > { %v1703_v2 = vpop.f32.mrf.mxu2 }
 0x1e3   : > { %v1704_v23 = vadd.f32 %v1703_v2, %v1535_v0 }
 0x1e4   : > { %v1748_v11 = vpop.f32.mrf.mxu3 }
 0x1e5   : > { %v1806_v12 = vadd.f32 %v1704_v23, %v351_v1  ;;  %v1749_v13 = vadd.f32 %v1748_v11, %v1580_v56  ;;  %v373_v1 = vld [vmem:[%s3393_s6 + $0x1e0] sm:$0xff] }
 0x1e6   : > { %v1367_v14 = vpop.f32.mrf.mxu0 }
 0x1e7   : > { %1871 = vst.msk [vmem:[%s3393_s6 + $0x130] sm:$0xff] %vm248_vm3, %v1806_v12  ;;  %v1824_v16 = vadd.f32 %v1749_v13, %v369_v9  ;;  %v1536_v7 = vpop.f32.mrf.mxu1 }
 0x1e8   : > { %v1537_v20 = vadd.f32 %v1536_v7, %v1367_v14  ;;  %v356_v14 = vld [vmem:[%s3393_s6 + $0x158] sm:$0xff]  ;;  %v374_v7 = vld [vmem:[%s3393_s6 + $0x1e8] sm:$0xff] }
 0x1e9   : > { %1889 = vst.msk [vmem:[%s3393_s6 + $0x1c0] sm:$0xff] %vm248_vm3, %v1824_v16 }
 0x1ea   : > { %v1705_v18 = vpop.f32.mrf.mxu2 }
 0x1eb   : > { %v1706_v42 = vadd.f32 %v1705_v18, %v1537_v20 }
 0x1ec   : > { %v1750_v26 = vpop.f32.mrf.mxu3 }
 0x1ed   : > { %v1807_v27 = vadd.f32 %v1706_v42, %v352_v17  ;;  %v1751_v28 = vadd.f32 %v1750_v26, %v1582_v4 }
 0x1ee   : > { %v1370_v30 = vpop.f32.mrf.mxu0 }
 0x1ef   : > { %1872 = vst.msk [vmem:[%s3393_s6 + $0x138] sm:$0xff] %vm248_vm3, %v1807_v27  ;;  %v1825_v33 = vadd.f32 %v1751_v28, %v370_v21  ;;  %v1539_v34 = vpop.f32.mrf.mxu1  ;;  %v357_v27 = vld [vmem:[%s3393_s6 + $0x160] sm:$0xff] }
 0x1f0   : > { %v1540_v36 = vadd.f32 %v1539_v34, %v1370_v30  ;;  %v375_v30 = vld [vmem:[%s3393_s6 + $0x1f0] sm:$0xff] }
 0x1f1   : > { %1890 = vst.msk [vmem:[%s3393_s6 + $0x1c8] sm:$0xff] %vm248_vm3, %v1825_v33 }
 0x1f2   : > { %v1708_v46 = vpop.f32.mrf.mxu2 }
 0x1f3   : > { %v1709_v3 = vadd.f32 %v1708_v46, %v1540_v36 }
 0x1f4   : > { %v1753_v41 = vpop.f32.mrf.mxu3 }
 0x1f5   : > { %v1808_v38 = vadd.f32 %v1709_v3, %v353_v25  ;;  %v1754_v48 = vadd.f32 %v1753_v41, %v1585_v22 }
 0x1f6   : > { %v1372_v43 = vpop.f32.mrf.mxu0 }
 0x1f7   : > { %1873 = vst.msk [vmem:[%s3393_s6 + $0x140] sm:$0xff] %vm248_vm3, %v1808_v38  ;;  %v1826_v44 = vadd.f32 %v1754_v48, %v371_v39  ;;  %v1541_v45 = vpop.f32.mrf.mxu1  ;;  %v358_v39 = vld [vmem:[%s3393_s6 + $0x168] sm:$0xff]  ;;  %v376_v38 = vld [vmem:[%s3393_s6 + $0x1f8] sm:$0xff] }
 0x1f8   : > { %v1542_v49 = vadd.f32 %v1541_v45, %v1372_v43 }
 0x1f9   : > { %1891 = vst.msk [vmem:[%s3393_s6 + $0x1d0] sm:$0xff] %vm248_vm3, %v1826_v44 }
 0x1fa   : > { %v1710_v53 = vpop.f32.mrf.mxu2 }
 0x1fb   : > { %v1711_v19 = vadd.f32 %v1710_v53, %v1542_v49 }
 0x1fc   : > { %v1755_v63 = vpop.f32.mrf.mxu3 }
 0x1fd   : > { %v1809_v54 = vadd.f32 %v1711_v19, %v354_v52  ;;  %v1756_v57 = vadd.f32 %v1755_v63, %v1587_v35  ;;  %v359_v35 = vld [vmem:[%s3393_s6 + $0x170] sm:$0xff] }
 0x1fe   : > { %v1375_v58 = vpop.f32.mrf.mxu0 }
 0x1ff   : > { %1874 = vst.msk [vmem:[%s3393_s6 + $0x148] sm:$0xff] %vm248_vm3, %v1809_v54  ;;  %v1827_v59 = vadd.f32 %v1756_v57, %v372_v37  ;;  %v1544_v61 = vpop.f32.mrf.mxu1  ;;  %v360_v57 = vld [vmem:[%s3393_s6 + $0x178] sm:$0xff] }
 0x200   : > { %v1545_v6 = vadd.f32 %v1544_v61, %v1375_v58 }
 0x201   : > { %1892 = vst.msk [vmem:[%s3393_s6 + $0x1d8] sm:$0xff] %vm248_vm3, %v1827_v59 }
 0x202   : > { %v1713_v0 = vpop.f32.mrf.mxu2 }
 0x203   : > { %v1714_v51 = vadd.f32 %v1713_v0, %v1545_v6  ;;  %v1560_v6 = vadd.f32 %v3760_v10, %v3535_v15 }
 0x204   : > { %v1758_v2 = vpop.f32.mrf.mxu3 }
 0x205   : > { %v1810_v56 = vadd.f32 %v1714_v51, %v355_v62  ;;  %v1759_v23 = vadd.f32 %v1758_v2, %v1590_v55  ;;  %v361_v62 = vld [vmem:[%s3393_s6 + $0x180] sm:$0xff]  ;;  %v362_v2 = vld [vmem:[%s3393_s6 + $0x188] sm:$0xff] }
 0x206   : > { %v1377_v9 = vpop.f32.mrf.mxu0 }
 0x207   : > { %1875 = vst.msk [vmem:[%s3393_s6 + $0x150] sm:$0xff] %vm248_vm3, %v1810_v56  ;;  %v1828_v11 = vadd.f32 %v1759_v23, %v373_v1  ;;  %v1546_v12 = vpop.f32.mrf.mxu1  ;;  %v1562_v1 = vadd.f32 %v3773_v32, %v3568_v29 }
 0x208   : > { %v1547_v13 = vadd.f32 %v1546_v12, %v1377_v9 }
 0x209   : > { %1893 = vst.msk [vmem:[%s3393_s6 + $0x1e0] sm:$0xff] %vm248_vm3, %v1828_v11 }
 0x20a   : > { %v1715_v16 = vpop.f32.mrf.mxu2 }
 0x20b   : > { %v1716_v5 = vadd.f32 %v1715_v16, %v1547_v13 }
 0x20c   : > { %v1760_v20 = vpop.f32.mrf.mxu3 }
 0x20d   : > { %v1811_v17 = vadd.f32 %v1716_v5, %v356_v14  ;;  %v1761_v18 = vadd.f32 %v1760_v20, %v1592_v47 }
 0x20e   : > { %v1380_v4 = vpop.f32.mrf.mxu0 }
 0x20f   : > { %1876 = vst.msk [vmem:[%s3393_s6 + $0x158] sm:$0xff] %vm248_vm3, %v1811_v17  ;;  %v1829_v42 = vadd.f32 %v1761_v18, %v374_v7  ;;  %v1549_v21 = vpop.f32.mrf.mxu1 }
 0x210   : > { %v1550_v26 = vadd.f32 %v1549_v21, %v1380_v4 }
 0x211   : > { %1894 = vst.msk [vmem:[%s3393_s6 + $0x1e8] sm:$0xff] %vm248_vm3, %v1829_v42 }
 0x212   : > { %v1718_v28 = vpop.f32.mrf.mxu2 }
 0x213   : > { %v1719_v31 = vadd.f32 %v1718_v28, %v1550_v26 }
 0x214   : > { %v1763_v33 = vpop.f32.mrf.mxu3 }
 0x215   : > { %v1812_v34 = vadd.f32 %v1719_v31, %v357_v27  ;;  %v1764_v36 = vadd.f32 %v1763_v33, %v1595_v24 }
 0x216   : > { %v1382_v25 = vpop.f32.mrf.mxu0 }
 0x217   : > { %1877 = vst.msk [vmem:[%s3393_s6 + $0x160] sm:$0xff] %vm248_vm3, %v1812_v34  ;;  %v1830_v46 = vadd.f32 %v1764_v36, %v375_v30  ;;  %v1551_v22 = vpop.f32.mrf.mxu1 }
 0x218   : > { %v1552_v3 = vadd.f32 %v1551_v22, %v1382_v25 }
 0x219   : > { %1895 = vst.msk [vmem:[%s3393_s6 + $0x1f0] sm:$0xff] %vm248_vm3, %v1830_v46 }
 0x21a   : > { %v1720_v41 = vpop.f32.mrf.mxu2 }
 0x21b   : > { %v1721_v50 = vadd.f32 %v1720_v41, %v1552_v3 }
 0x21c   : > { %v1765_v48 = vpop.f32.mrf.mxu3 }
 0x21d   : > { %v1813_v43 = vadd.f32 %v1721_v50, %v358_v39  ;;  %v1766_v44 = vadd.f32 %v1765_v48, %v1597_v40 }
 0x21e   : > { %v1385_v45 = vpop.f32.mrf.mxu0 }
 0x21f   : > { %1878 = vst.msk [vmem:[%s3393_s6 + $0x168] sm:$0xff] %vm248_vm3, %v1813_v43  ;;  %v1831_v49 = vadd.f32 %v1766_v44, %v376_v38  ;;  %v1554_v52 = vpop.f32.mrf.mxu1 }
 0x220   : > { %v1555_v53 = vadd.f32 %v1554_v52, %v1385_v45 }
 0x221   : > { %1896 = vst.msk [vmem:[%s3393_s6 + $0x1f8] sm:$0xff] %vm248_vm3, %v1831_v49 }
 0x222   : > { %v1723_v19 = vpop.f32.mrf.mxu2 }
 0x223   : > { %v1724_v60 = vadd.f32 %v1723_v19, %v1555_v53 }
 0x225   : > { %v1814_v8 = vadd.f32 %v1724_v60, %v359_v35 }
 0x226   : > { %v1387_v37 = vpop.f32.mrf.mxu0 }
 0x227   : > { %1879 = vst.msk [vmem:[%s3393_s6 + $0x170] sm:$0xff] %vm248_vm3, %v1814_v8  ;;  %v1556_v63 = vpop.f32.mrf.mxu1 }
 0x228   : > { %v1557_v54 = vadd.f32 %v1556_v63, %v1387_v37 }
 0x22a   : > { %v1725_v58 = vpop.f32.mrf.mxu2 }
 0x22b   : > { %v1726_v59 = vadd.f32 %v1725_v58, %v1557_v54 }
 0x22d   : > { %v1815_v61 = vadd.f32 %v1726_v59, %v360_v57 }
 0x22f   : > { %1880 = vst.msk [vmem:[%s3393_s6 + $0x178] sm:$0xff] %vm248_vm3, %v1815_v61 }
 0x232   : > { %v1728_v0 = vpop.f32.mrf.mxu2 }
 0x233   : > { %v1729_v55 = vadd.f32 %v1728_v0, %v1560_v6 }
 0x235   : > { %v1816_v51 = vadd.f32 %v1729_v55, %v361_v62 }
 0x237   : > { %1881 = vst.msk [vmem:[%s3393_s6 + $0x180] sm:$0xff] %vm248_vm3, %v1816_v51 }
 0x23a   : > { %v1730_v56 = vpop.f32.mrf.mxu2 }
 0x23b   : > { %v1731_v23 = vadd.f32 %v1730_v56, %v1562_v1  ;;  %1903 = sbr.rel (!%p3203_p3) target bundleno = 640 (0x280), region = 36 }
 0x23d   : > { %v1817_v9 = vadd.f32 %v1731_v23, %v362_v2 }
 0x23f   : > { %1882 = vst.msk [vmem:[%s3393_s6 + $0x188] sm:$0xff] %vm248_vm3, %v1817_v9 }
 0x240   : > { %s4200_s9 = smov (!%p1906_p9, %s1905_s9), 64 }
 0x241   : > { %s2786_s18 = sshll.u32 %s4200_s9, 3 }
 0x242   : > { %p2789_p10 = scmp.eq.s32.totalorder %s2786_s18, 0 }
 0x243   : > { %s4050_s20 = sshrl.u32 (!%p2789_p10), %s4200_s9, 5 }
 0x244   : > { %1915 = sbr.rel (%p2789_p10) target bundleno = 640 (0x280), region = 40  ;;  %p2790_p11 = scmp.le.s32.totalorder (!%p2789_p10), %s4050_s20, 0 }
 0x249   : > { %2211 = sbr.rel (%p2790_p11) target bundleno = 623 (0x26f), region = 119  ;;  %s4188_s11 = smov (!%p2790_p11), %s4044_s16 }
 0x24a   : > { %s4189_s17 = smov (!%p2790_p11), %s3393_s6  ;;  %s4059_s4 = smov (!%p2790_p11), 0  }
 0x24b   : > { %s4061_s21 = smov (!%p2790_p11), 0  }
 0x24e LB: >> { %v2040_v15 = vld [vmem:[%s3128_s17] sm:$0xff]  ;;  %v2042_v29 = vld [vmem:[%s3128_s17 + $0x8] sm:$0xff]  ;;  %v2044_v10 = vld [vmem:[%s3128_s17 + $0x10] sm:$0xff]  ;;  %s2104_s22 = sadd.s32 1, %s3132_s4  ;;  %s2034_s21 = sadd.s32 1, %s3136_s21   ;;  %s3136_s21 = sphi %s4061_s21, %s2034_s21   ;;  %s3132_s4 = sphi %s4059_s4, %s4192_s4   ;;  %s3128_s17 = sphi %s4189_s17, %s4191_s17   ;;  %s3124_s11 = sphi %s4188_s11, %s4190_s11  }
 0x24f   : >> { %2041 = vst [vmem:[%s3124_s11] sm:$0xff] %v2040_v15  ;;  %v2046_v32 = vld [vmem:[%s3128_s17 + $0x18] sm:$0xff]  ;;  %p2105_p12 = scmp.ge.s32.totalorder %s2104_s22, %s4050_s20  ;;  %v2048_v11 = vld [vmem:[%s3128_s17 + $0x20] sm:$0xff]  ;;  %v2050_v12 = vld [vmem:[%s3128_s17 + $0x28] sm:$0xff]  ;;  %p2033_p13 = scmp.ge.s32.totalorder %s2034_s21, %s4050_s20 }
 0x250   : >> { %2043 = vst [vmem:[%s3124_s11 + $0x8] sm:$0xff] %v2042_v29  ;;  %v2052_v13 = vld [vmem:[%s3128_s17 + $0x30] sm:$0xff]  ;;  %v2054_v14 = vld [vmem:[%s3128_s17 + $0x38] sm:$0xff]  ;;  %v2056_v16 = vld [vmem:[%s3128_s17 + $0x40] sm:$0xff] }
 0x251   : >> { %2045 = vst [vmem:[%s3124_s11 + $0x10] sm:$0xff] %v2044_v10  ;;  %s4202_s22 = smov (%p2105_p12, %s2104_s22), 0  ;;  %v2058_v47 = vld [vmem:[%s3128_s17 + $0x48] sm:$0xff]  ;;  %v2060_v5 = vld [vmem:[%s3128_s17 + $0x50] sm:$0xff]  ;;  %v2062_v7 = vld [vmem:[%s3128_s17 + $0x58] sm:$0xff] }
 0x252   : >> { %2047 = vst [vmem:[%s3124_s11 + $0x18] sm:$0xff] %v2046_v32  ;;  %s2791_s23 = sshll.u32 %s4202_s22, 8  ;;  %v2064_v20 = vld [vmem:[%s3128_s17 + $0x60] sm:$0xff]  ;;  %v2066_v17 = vld [vmem:[%s3128_s17 + $0x68] sm:$0xff]  ;;  %v2068_v18 = vld [vmem:[%s3128_s17 + $0x70] sm:$0xff]  ;;  %s4192_s4 = smov %s4202_s22 }
 0x253   : >> { %2049 = vst [vmem:[%s3124_s11 + $0x20] sm:$0xff] %v2048_v11  ;;  %s4093_s24 = scalar_lea.vmem %s3393_s6, %s2791_s23 [#allocation2]   ;;  %s4096_s25 = scalar_lea.vmem %s4044_s16, %s2791_s23   ;;  %v2070_v4 = vld [vmem:[%s3128_s17 + $0x78] sm:$0xff]  ;;  %v2072_v42 = vld [vmem:[%s3128_s17 + $0x80] sm:$0xff]  ;;  %v2074_v21 = vld [vmem:[%s3128_s17 + $0x88] sm:$0xff] }
 0x254   : >> { %2051 = vst [vmem:[%s3124_s11 + $0x28] sm:$0xff] %v2050_v12  ;;  %v2076_v26 = vld [vmem:[%s3128_s17 + $0x90] sm:$0xff]  ;;  %v2078_v27 = vld [vmem:[%s3128_s17 + $0x98] sm:$0xff]  ;;  %v2080_v28 = vld [vmem:[%s3128_s17 + $0xa0] sm:$0xff] }
 0x255   : >> { %2053 = vst [vmem:[%s3124_s11 + $0x30] sm:$0xff] %v2052_v13  ;;  %v2082_v24 = vld [vmem:[%s3128_s17 + $0xa8] sm:$0xff]  ;;  %v2084_v31 = vld [vmem:[%s3128_s17 + $0xb0] sm:$0xff]  ;;  %v2086_v30 = vld [vmem:[%s3128_s17 + $0xb8] sm:$0xff] }
 0x256   : >> { %2055 = vst [vmem:[%s3124_s11 + $0x38] sm:$0xff] %v2054_v14  ;;  %v2088_v33 = vld [vmem:[%s3128_s17 + $0xc0] sm:$0xff]  ;;  %v2090_v34 = vld [vmem:[%s3128_s17 + $0xc8] sm:$0xff]  ;;  %v2092_v36 = vld [vmem:[%s3128_s17 + $0xd0] sm:$0xff] }
 0x257   : >> { %2057 = vst [vmem:[%s3124_s11 + $0x40] sm:$0xff] %v2056_v16  ;;  %v2094_v25 = vld [vmem:[%s3128_s17 + $0xd8] sm:$0xff]  ;;  %v2096_v46 = vld [vmem:[%s3128_s17 + $0xe0] sm:$0xff]  ;;  %v2098_v22 = vld [vmem:[%s3128_s17 + $0xe8] sm:$0xff] }
 0x258   : >> { %2059 = vst [vmem:[%s3124_s11 + $0x48] sm:$0xff] %v2058_v47  ;;  %v2100_v3 = vld [vmem:[%s3128_s17 + $0xf0] sm:$0xff]  ;;  %v2102_v39 = vld [vmem:[%s3128_s17 + $0xf8] sm:$0xff]  ;;  %s4191_s17 = smov %s4093_s24 }
 0x259   : >> { %2061 = vst [vmem:[%s3124_s11 + $0x50] sm:$0xff] %v2060_v5 }
 0x25a   : >> { %2063 = vst [vmem:[%s3124_s11 + $0x58] sm:$0xff] %v2062_v7 }
 0x25b   : >> { %2065 = vst [vmem:[%s3124_s11 + $0x60] sm:$0xff] %v2064_v20 }
 0x25c   : >> { %2067 = vst [vmem:[%s3124_s11 + $0x68] sm:$0xff] %v2066_v17 }
 0x25d   : >> { %2069 = vst [vmem:[%s3124_s11 + $0x70] sm:$0xff] %v2068_v18 }
 0x25e   : >> { %2071 = vst [vmem:[%s3124_s11 + $0x78] sm:$0xff] %v2070_v4 }
 0x25f   : >> { %2073 = vst [vmem:[%s3124_s11 + $0x80] sm:$0xff] %v2072_v42 }
 0x260   : >> { %2075 = vst [vmem:[%s3124_s11 + $0x88] sm:$0xff] %v2074_v21 }
 0x261   : >> { %2077 = vst [vmem:[%s3124_s11 + $0x90] sm:$0xff] %v2076_v26 }
 0x262   : >> { %2079 = vst [vmem:[%s3124_s11 + $0x98] sm:$0xff] %v2078_v27 }
 0x263   : >> { %2081 = vst [vmem:[%s3124_s11 + $0xa0] sm:$0xff] %v2080_v28 }
 0x264   : >> { %2083 = vst [vmem:[%s3124_s11 + $0xa8] sm:$0xff] %v2082_v24 }
 0x265   : >> { %2085 = vst [vmem:[%s3124_s11 + $0xb0] sm:$0xff] %v2084_v31 }
 0x266   : >> { %2087 = vst [vmem:[%s3124_s11 + $0xb8] sm:$0xff] %v2086_v30 }
 0x267   : >> { %2089 = vst [vmem:[%s3124_s11 + $0xc0] sm:$0xff] %v2088_v33 }
 0x268   : >> { %2091 = vst [vmem:[%s3124_s11 + $0xc8] sm:$0xff] %v2090_v34 }
 0x269   : >> { %2093 = vst [vmem:[%s3124_s11 + $0xd0] sm:$0xff] %v2092_v36 }
 0x26a   : >> { %2095 = vst [vmem:[%s3124_s11 + $0xd8] sm:$0xff] %v2094_v25  ;;  %2036 = sbr.rel (!%p2033_p13) target bundleno = 590 (0x24e), region = 125 }
 0x26b   : >> { %2097 = vst [vmem:[%s3124_s11 + $0xe0] sm:$0xff] %v2096_v46 }
 0x26c   : >> { %2099 = vst [vmem:[%s3124_s11 + $0xe8] sm:$0xff] %v2098_v22 }
 0x26d   : >> { %2101 = vst [vmem:[%s3124_s11 + $0xf0] sm:$0xff] %v2100_v3 }
 0x26e   : >> { %2103 = vst [vmem:[%s3124_s11 + $0xf8] sm:$0xff] %v2102_v39  ;;  %s4190_s11 = smov %s4096_s25 }
 0x26f PF: > { %s4161_s26 = sand.u32 31, %s4200_s9   ;;  %s2919_s27 = sshll.u32 %s4050_s20, 8 }
 0x270   : > { %s2115_s28 = scalar_lea.vmem %s3393_s6, %s2919_s27 [#allocation2]   ;;  %s2117_s29 = scalar_lea.vmem %s4044_s16, %s2919_s27  }
 0x271   : > { %p2796_p0 = scmp.le.s32.totalorder %s4161_s26, 0 }
 0x272   : > { %s3138_s30 = smov (!%p2796_p0), %s2117_s29   ;;  %s3142_s3 = smov (!%p2796_p0), %s2115_s28  }
 0x273   : > { %2225 = sbr.rel (%p2796_p0) target bundleno = 640 (0x280), region = 130  ;;  %s3146_s5 = smov (!%p2796_p0), 0  }
 0x274   : > { %s3150_s7 = smov (!%p2796_p0), 0  }
 0x278 LB: >> { %v2127_v41 = vld [vmem:[%s3144_s3] sm:$0xff]  ;;  %s2129_s9 = sadd.s32 1, %s3148_s5  ;;  %s2121_s7 = sadd.s32 1, %s3152_s7   ;;  %s3152_s7 = sphi %s3150_s7, %s2121_s7   ;;  %s3148_s5 = sphi %s3146_s5, %s3147_s5   ;;  %s3144_s3 = sphi %s3142_s3, %s2134_s3   ;;  %s3140_s30 = sphi %s3138_s30, %s2135_s30  }
 0x279   : >> { %2128 = vst [vmem:[%s3140_s30] sm:$0xff] %v2127_v41  ;;  %p2130_p1 = scmp.ge.s32.totalorder %s2129_s9, %s4161_s26  ;;  %p2120_p2 = scmp.ge.s32.totalorder %s2121_s7, %s4161_s26 }
 0x27b   : >> { %s4204_s9 = smov (%p2130_p1, %s2129_s9), 0  ;;  %2123 = sbr.rel (!%p2120_p2) target bundleno = 632 (0x278), region = 136 }
 0x27c   : >> { %s2797_s6 = sshll.u32 %s4204_s9, 3  ;;  %s3147_s5 = smov %s4204_s9  }
 0x27d   : >> { %s2134_s3 = scalar_lea.vmem %s2115_s28, %s2797_s6 [#allocation2]   ;;  %s2135_s30 = scalar_lea.vmem %s2117_s29, %s2797_s6  }
 0x280 PF: > { %s12_s13 = sadd.s32 1, %s3120_s13   ;;  %s4193_s9 = smov %s3108_s10 }
 0x281   : > { %p9_p3 = scmp.ge.s32.totalorder %s12_s13, 71   ;;  %s4194_s10 = smov %s3212_s19 }
 0x282   : > { %s4195_s11 = smov %s3116_s12  ;;  %s4196_s12 = smov %s4198_s15 }
 0x283   :  { %11 = sbr.rel (!%p9_p3) target bundleno = 3 (0x3), region = 147 }

</bundles_post_ra>
